<compile_context>
chip_gen: v5e
topology: v5e:2x2
jax: 0.10.0
libtpu: 0.0.40
codegen_flags: <defaults>
</compile_context>

<pallas_src>
import jax
import jax.numpy as jnp
from jax.experimental import pallas as pl
from jax.experimental.pallas import tpu as pltpu


def _round_up(x, m):
    return (x + m - 1) // m * m


# torch nn.LSTM gate order is [i, f, g, o]; kernel uses [i, f, o, g] so the
# three sigmoid gates are lane-contiguous.
_TORCH_TO_IFOG = (0, 1, 3, 2)


def _reorder_pad_gates(w_t, H, Hp):
    """(K, 4H) in torch gate order [i,f,g,o] -> (K, 4*Hp) in [i,f,o,g] order,
    each gate block zero-padded from H to Hp lanes."""
    K = w_t.shape[0]
    out = jnp.zeros((K, 4 * Hp), w_t.dtype)
    for dst, src in enumerate(_TORCH_TO_IFOG):
        out = out.at[:, dst * Hp:dst * Hp + H].set(w_t[:, src * H:(src + 1) * H])
    return out


def _lstm_kernel_factory(T, In, Hp):
    def kernel(x_ref, wih_ref, whh_ref, b_ref, wl_ref, bl_ref, o_ref):
        x = x_ref[...]                     # (T, In)    f32
        wih = wih_ref[...]                 # (In, 4Hp)  f32
        whh = whh_ref[...]                 # (Hp, 4Hp)  bf16 (MXU operand)

        # Hoisted input projection for ALL T steps as a VPU broadcast-multiply
        # over the (tiny, static) In columns + fused bias. Padded gate lanes of
        # wih/b are zero, so padded lanes of `pre` are exactly 0.
        pre = x[:, 0:1] * wih[0:1, :]
        for k in range(1, In):
            pre = pre + x[:, k:k + 1] * wih[k:k + 1, :]
        pre = pre + b_ref[...]             # (T, 4Hp)   f32, ~4 vregs at T=8

        h = jnp.zeros((1, Hp), jnp.float32)
        c = jnp.zeros((1, Hp), jnp.float32)

        # Fully unrolled recurrence; h/c stay in vregs, `pre` sliced statically.
        # Padded lanes stay 0: gates_pad = 0 -> f_pad,i_pad = 0.5, g_pad = 0
        # -> c_pad stays 0 -> h_pad = 0.5*tanh(0) = 0.
        for t in range(T):
            gates = pre[t:t + 1, :] + jnp.dot(
                h.astype(jnp.bfloat16), whh,
                preferred_element_type=jnp.float32)            # (1, 4Hp) f32
            # Gate order [i, f, o, g]: one sigmoid over 3 lane-aligned blocks
            # + one tanh (2 EUP chains per step instead of 4).
            ifo = jax.nn.sigmoid(gates[:, :3 * Hp])
            g = jnp.tanh(gates[:, 3 * Hp:])
            i = ifo[:, 0 * Hp:1 * Hp]
            f = ifo[:, 1 * Hp:2 * Hp]
            o = ifo[:, 2 * Hp:3 * Hp]
            c = f * c + i * g
            h = o * jnp.tanh(c)

        # Final linear on the last hidden state == predictions[-1];
        # (1, Op) lane-dense unmasked store.
        o_ref[...] = (
            jnp.dot(h.astype(jnp.bfloat16), wl_ref[...],
                    preferred_element_type=jnp.float32)
            + bl_ref[...]
        )

    return kernel


def make_lstm_forward(w_ih, w_hh, b_ih, b_hh, w_lin, b_lin):
    """One-time weight preprocessing; returns a jitted forward(x) reusable per call."""
    In = w_ih.shape[1]
    H = w_hh.shape[1]
    O = w_lin.shape[0]
    Hp = _round_up(H, 128)
    Op = _round_up(O, 128)

    # W_ih^T -> (In, 4*Hp) f32 (VPU input projection; In kept tiny, not padded).
    wih_p = _reorder_pad_gates(w_ih.T.astype(jnp.float32), H, Hp)
    # W_hh^T -> (Hp, 4*Hp) bf16 MXU operand (rows and gate cols zero-padded).
    whh_p = jnp.zeros((Hp, 4 * Hp), jnp.float32).at[:H].set(
        _reorder_pad_gates(w_hh.T.astype(jnp.float32), H, Hp)).astype(jnp.bfloat16)
    # Fused bias (b_ih + b_hh) -> (1, 4*Hp) f32.
    b_p = _reorder_pad_gates(
        (b_ih + b_hh).reshape(1, 4 * H).astype(jnp.float32), H, Hp)
    # Final linear: W^T -> (Hp, Op) bf16; bias -> (1, Op) f32 (lane-dense store).
    wl_p = jnp.zeros((Hp, Op), jnp.float32).at[:H, :O].set(
        w_lin.T.astype(jnp.float32)).astype(jnp.bfloat16)
    bl_p = jnp.zeros((1, Op), jnp.float32).at[:, :O].set(
        b_lin.reshape(1, O).astype(jnp.float32))

    # Commit padded weights to device once; every forward() call reuses them.
    wih_p, whh_p, b_p, wl_p, bl_p = jax.device_put((wih_p, whh_p, b_p, wl_p, bl_p))

    @jax.jit
    def forward(x):
        xf = x.astype(jnp.float32).reshape(x.shape[0], -1)  # == input_seq.view(T,1,-1)
        T, In_x = xf.shape
        assert In_x == In, (In_x, In)
        kernel = _lstm_kernel_factory(T, In, Hp)
        out = pl.pallas_call(
            kernel,
            out_shape=jax.ShapeDtypeStruct((1, Op), jnp.float32),
            in_specs=[pl.BlockSpec(memory_space=pltpu.MemorySpace.VMEM)] * 6,
            out_specs=pl.BlockSpec(memory_space=pltpu.MemorySpace.VMEM),
        )(xf, wih_p, whh_p, b_p, wl_p, bl_p)
        return out[0, :O]                                    # predictions[-1], (O,)

    return forward


def _reference(x, w_ih, w_hh, b_ih, b_hh, w_lin, b_lin):
    """Pure-JAX f32 reference mirroring torch.nn.LSTM + Linear semantics."""
    T = x.shape[0]
    H = w_hh.shape[1]
    h = jnp.zeros((1, H), jnp.float32)
    c = jnp.zeros((1, H), jnp.float32)
    for t in range(T):
        gates = x[t:t + 1] @ w_ih.T + h @ w_hh.T + b_ih + b_hh
        i = jax.nn.sigmoid(gates[:, 0 * H:1 * H])
        f = jax.nn.sigmoid(gates[:, 1 * H:2 * H])
        g = jnp.tanh(gates[:, 2 * H:3 * H])
        o = jax.nn.sigmoid(gates[:, 3 * H:4 * H])
        c = f * c + i * g
        h = o * jnp.tanh(c)
    pred = h @ w_lin.T + b_lin
    return pred[0]


if __name__ == "__main__":
    # Small shapes consistent with the module: input_size=1, output_size=1,
    # hidden_layer_size shrunk to 32, seq_len = 8.
    T, IN, H, OUT = 8, 1, 32, 1

    key = jax.random.PRNGKey(0)
    ks = jax.random.split(key, 7)
    scale = 1.0 / jnp.sqrt(H)
    x      = jax.random.normal(ks[0], (T, IN), jnp.float32)
    w_ih   = jax.random.uniform(ks[1], (4 * H, IN), jnp.float32, -scale, scale)
    w_hh   = jax.random.uniform(ks[2], (4 * H, H), jnp.float32, -scale, scale)
    b_ih   = jax.random.uniform(ks[3], (4 * H,), jnp.float32, -scale, scale)
    b_hh   = jax.random.uniform(ks[4], (4 * H,), jnp.float32, -scale, scale)
    w_lin  = jax.random.uniform(ks[5], (OUT, H), jnp.float32, -scale, scale)
    b_lin  = jax.random.uniform(ks[6], (OUT,), jnp.float32, -scale, scale)

    # One-time prep (padding / reorder / bf16 cast); reuse `forward` per call.
    forward = make_lstm_forward(w_ih, w_hh, b_ih, b_hh, w_lin, b_lin)

    out = forward(x)
    out = jax.block_until_ready(out)

    ref = _reference(x, w_ih, w_hh, b_ih, b_hh, w_lin, b_lin)
    assert out.shape == (OUT,)
    # bf16 MXU operands with f32 accumulation: tolerance loosened accordingly.
    assert jnp.allclose(out, ref, atol=2e-2, rtol=2e-2), (out, ref)

    print("KERNEL_OK")
</pallas_src>

<mosaic_0001>
module attributes {stable_mosaic.version = 11 : i64} {
  func.func @kernel(%arg0: memref<8x1xf32, #tpu.memory_space<vmem>>, %arg1: memref<1x512xf32, #tpu.memory_space<vmem>>, %arg2: memref<128x512xbf16, #tpu.memory_space<vmem>>, %arg3: memref<1x512xf32, #tpu.memory_space<vmem>>, %arg4: memref<128x128xbf16, #tpu.memory_space<vmem>>, %arg5: memref<1x128xf32, #tpu.memory_space<vmem>>, %arg6: memref<1x128xf32, #tpu.memory_space<vmem>>) attributes {dimension_semantics = [], scalar_prefetch = 0 : i64, scratch_operands = 0 : i64, tpu.core_type = #tpu.core_type<tc>} {
    %c0 = arith.constant 0 : index
    %c0_0 = arith.constant 0 : index
    %0 = vector.load %arg0[%c0, %c0_0] : memref<8x1xf32, #tpu.memory_space<vmem>>, vector<8x1xf32>
    %c0_1 = arith.constant 0 : index
    %c0_2 = arith.constant 0 : index
    %1 = vector.load %arg1[%c0_1, %c0_2] : memref<1x512xf32, #tpu.memory_space<vmem>>, vector<1x512xf32>
    %c0_3 = arith.constant 0 : index
    %c0_4 = arith.constant 0 : index
    %2 = vector.load %arg2[%c0_3, %c0_4] : memref<128x512xbf16, #tpu.memory_space<vmem>>, vector<128x512xbf16>
    %3 = vector.broadcast %0 : vector<8x1xf32> to vector<8x512xf32>
    %4 = vector.broadcast %1 : vector<1x512xf32> to vector<8x512xf32>
    %5 = arith.mulf %3, %4 : vector<8x512xf32>
    %c0_5 = arith.constant 0 : index
    %c0_6 = arith.constant 0 : index
    %6 = vector.load %arg3[%c0_5, %c0_6] : memref<1x512xf32, #tpu.memory_space<vmem>>, vector<1x512xf32>
    %7 = vector.broadcast %6 : vector<1x512xf32> to vector<8x512xf32>
    %8 = arith.addf %5, %7 : vector<8x512xf32>
    %cst = arith.constant 0.000000e+00 : f32
    %9 = vector.broadcast %cst : f32 to vector<1x128xf32>
    %cst_7 = arith.constant 0.000000e+00 : f32
    %10 = vector.broadcast %cst_7 : f32 to vector<1x128xf32>
    %11 = vector.extract_strided_slice %8 {offsets = [0, 0], sizes = [1, 512], strides = [1, 1]} : vector<8x512xf32> to vector<1x512xf32>
    %12 = arith.truncf %9 : vector<1x128xf32> to vector<1x128xbf16>
    %cst_8 = arith.constant dense<0.000000e+00> : vector<1x512xf32>
    %13 = tpu.matmul %12, %2, %cst_8 {dimension_numbers = #tpu.dot_dimension_numbers<[1], [0], [0], [1], [0, 0, 1, 1], [], []>} : vector<1x128xbf16>, vector<128x512xbf16>, vector<1x512xf32> -> vector<1x512xf32>
    %14 = arith.addf %11, %13 : vector<1x512xf32>
    %15 = vector.extract_strided_slice %14 {offsets = [0, 0], sizes = [1, 384], strides = [1, 1]} : vector<1x512xf32> to vector<1x384xf32>
    %16 = arith.negf %15 : vector<1x384xf32>
    %17 = math.exp %16 : vector<1x384xf32>
    %cst_9 = arith.constant 1.000000e+00 : f32
    %18 = vector.broadcast %cst_9 : f32 to vector<1x384xf32>
    %19 = arith.addf %18, %17 : vector<1x384xf32>
    %20 = arith.divf %18, %19 : vector<1x384xf32>
    %21 = vector.extract_strided_slice %14 {offsets = [0, 384], sizes = [1, 128], strides = [1, 1]} : vector<1x512xf32> to vector<1x128xf32>
    %22 = math.tanh %21 : vector<1x128xf32>
    %23 = vector.extract_strided_slice %20 {offsets = [0, 0], sizes = [1, 128], strides = [1, 1]} : vector<1x384xf32> to vector<1x128xf32>
    %24 = vector.extract_strided_slice %20 {offsets = [0, 128], sizes = [1, 128], strides = [1, 1]} : vector<1x384xf32> to vector<1x128xf32>
    %25 = vector.extract_strided_slice %20 {offsets = [0, 256], sizes = [1, 128], strides = [1, 1]} : vector<1x384xf32> to vector<1x128xf32>
    %26 = arith.mulf %24, %10 : vector<1x128xf32>
    %27 = arith.mulf %23, %22 : vector<1x128xf32>
    %28 = arith.addf %26, %27 : vector<1x128xf32>
    %29 = math.tanh %28 : vector<1x128xf32>
    %30 = arith.mulf %25, %29 : vector<1x128xf32>
    %31 = vector.extract_strided_slice %8 {offsets = [1, 0], sizes = [1, 512], strides = [1, 1]} : vector<8x512xf32> to vector<1x512xf32>
    %32 = arith.truncf %30 : vector<1x128xf32> to vector<1x128xbf16>
    %cst_10 = arith.constant dense<0.000000e+00> : vector<1x512xf32>
    %33 = tpu.matmul %32, %2, %cst_10 {dimension_numbers = #tpu.dot_dimension_numbers<[1], [0], [0], [1], [0, 0, 1, 1], [], []>} : vector<1x128xbf16>, vector<128x512xbf16>, vector<1x512xf32> -> vector<1x512xf32>
    %34 = arith.addf %31, %33 : vector<1x512xf32>
    %35 = vector.extract_strided_slice %34 {offsets = [0, 0], sizes = [1, 384], strides = [1, 1]} : vector<1x512xf32> to vector<1x384xf32>
    %36 = arith.negf %35 : vector<1x384xf32>
    %37 = math.exp %36 : vector<1x384xf32>
    %cst_11 = arith.constant 1.000000e+00 : f32
    %38 = vector.broadcast %cst_11 : f32 to vector<1x384xf32>
    %39 = arith.addf %38, %37 : vector<1x384xf32>
    %40 = arith.divf %38, %39 : vector<1x384xf32>
    %41 = vector.extract_strided_slice %34 {offsets = [0, 384], sizes = [1, 128], strides = [1, 1]} : vector<1x512xf32> to vector<1x128xf32>
    %42 = math.tanh %41 : vector<1x128xf32>
    %43 = vector.extract_strided_slice %40 {offsets = [0, 0], sizes = [1, 128], strides = [1, 1]} : vector<1x384xf32> to vector<1x128xf32>
    %44 = vector.extract_strided_slice %40 {offsets = [0, 128], sizes = [1, 128], strides = [1, 1]} : vector<1x384xf32> to vector<1x128xf32>
    %45 = vector.extract_strided_slice %40 {offsets = [0, 256], sizes = [1, 128], strides = [1, 1]} : vector<1x384xf32> to vector<1x128xf32>
    %46 = arith.mulf %44, %28 : vector<1x128xf32>
    %47 = arith.mulf %43, %42 : vector<1x128xf32>
    %48 = arith.addf %46, %47 : vector<1x128xf32>
    %49 = math.tanh %48 : vector<1x128xf32>
    %50 = arith.mulf %45, %49 : vector<1x128xf32>
    %51 = vector.extract_strided_slice %8 {offsets = [2, 0], sizes = [1, 512], strides = [1, 1]} : vector<8x512xf32> to vector<1x512xf32>
    %52 = arith.truncf %50 : vector<1x128xf32> to vector<1x128xbf16>
    %cst_12 = arith.constant dense<0.000000e+00> : vector<1x512xf32>
    %53 = tpu.matmul %52, %2, %cst_12 {dimension_numbers = #tpu.dot_dimension_numbers<[1], [0], [0], [1], [0, 0, 1, 1], [], []>} : vector<1x128xbf16>, vector<128x512xbf16>, vector<1x512xf32> -> vector<1x512xf32>
    %54 = arith.addf %51, %53 : vector<1x512xf32>
    %55 = vector.extract_strided_slice %54 {offsets = [0, 0], sizes = [1, 384], strides = [1, 1]} : vector<1x512xf32> to vector<1x384xf32>
    %56 = arith.negf %55 : vector<1x384xf32>
    %57 = math.exp %56 : vector<1x384xf32>
    %cst_13 = arith.constant 1.000000e+00 : f32
    %58 = vector.broadcast %cst_13 : f32 to vector<1x384xf32>
    %59 = arith.addf %58, %57 : vector<1x384xf32>
    %60 = arith.divf %58, %59 : vector<1x384xf32>
    %61 = vector.extract_strided_slice %54 {offsets = [0, 384], sizes = [1, 128], strides = [1, 1]} : vector<1x512xf32> to vector<1x128xf32>
    %62 = math.tanh %61 : vector<1x128xf32>
    %63 = vector.extract_strided_slice %60 {offsets = [0, 0], sizes = [1, 128], strides = [1, 1]} : vector<1x384xf32> to vector<1x128xf32>
    %64 = vector.extract_strided_slice %60 {offsets = [0, 128], sizes = [1, 128], strides = [1, 1]} : vector<1x384xf32> to vector<1x128xf32>
    %65 = vector.extract_strided_slice %60 {offsets = [0, 256], sizes = [1, 128], strides = [1, 1]} : vector<1x384xf32> to vector<1x128xf32>
    %66 = arith.mulf %64, %48 : vector<1x128xf32>
    %67 = arith.mulf %63, %62 : vector<1x128xf32>
    %68 = arith.addf %66, %67 : vector<1x128xf32>
    %69 = math.tanh %68 : vector<1x128xf32>
    %70 = arith.mulf %65, %69 : vector<1x128xf32>
    %71 = vector.extract_strided_slice %8 {offsets = [3, 0], sizes = [1, 512], strides = [1, 1]} : vector<8x512xf32> to vector<1x512xf32>
    %72 = arith.truncf %70 : vector<1x128xf32> to vector<1x128xbf16>
    %cst_14 = arith.constant dense<0.000000e+00> : vector<1x512xf32>
    %73 = tpu.matmul %72, %2, %cst_14 {dimension_numbers = #tpu.dot_dimension_numbers<[1], [0], [0], [1], [0, 0, 1, 1], [], []>} : vector<1x128xbf16>, vector<128x512xbf16>, vector<1x512xf32> -> vector<1x512xf32>
    %74 = arith.addf %71, %73 : vector<1x512xf32>
    %75 = vector.extract_strided_slice %74 {offsets = [0, 0], sizes = [1, 384], strides = [1, 1]} : vector<1x512xf32> to vector<1x384xf32>
    %76 = arith.negf %75 : vector<1x384xf32>
    %77 = math.exp %76 : vector<1x384xf32>
    %cst_15 = arith.constant 1.000000e+00 : f32
    %78 = vector.broadcast %cst_15 : f32 to vector<1x384xf32>
    %79 = arith.addf %78, %77 : vector<1x384xf32>
    %80 = arith.divf %78, %79 : vector<1x384xf32>
    %81 = vector.extract_strided_slice %74 {offsets = [0, 384], sizes = [1, 128], strides = [1, 1]} : vector<1x512xf32> to vector<1x128xf32>
    %82 = math.tanh %81 : vector<1x128xf32>
    %83 = vector.extract_strided_slice %80 {offsets = [0, 0], sizes = [1, 128], strides = [1, 1]} : vector<1x384xf32> to vector<1x128xf32>
    %84 = vector.extract_strided_slice %80 {offsets = [0, 128], sizes = [1, 128], strides = [1, 1]} : vector<1x384xf32> to vector<1x128xf32>
    %85 = vector.extract_strided_slice %80 {offsets = [0, 256], sizes = [1, 128], strides = [1, 1]} : vector<1x384xf32> to vector<1x128xf32>
    %86 = arith.mulf %84, %68 : vector<1x128xf32>
    %87 = arith.mulf %83, %82 : vector<1x128xf32>
    %88 = arith.addf %86, %87 : vector<1x128xf32>
    %89 = math.tanh %88 : vector<1x128xf32>
    %90 = arith.mulf %85, %89 : vector<1x128xf32>
    %91 = vector.extract_strided_slice %8 {offsets = [4, 0], sizes = [1, 512], strides = [1, 1]} : vector<8x512xf32> to vector<1x512xf32>
    %92 = arith.truncf %90 : vector<1x128xf32> to vector<1x128xbf16>
    %cst_16 = arith.constant dense<0.000000e+00> : vector<1x512xf32>
    %93 = tpu.matmul %92, %2, %cst_16 {dimension_numbers = #tpu.dot_dimension_numbers<[1], [0], [0], [1], [0, 0, 1, 1], [], []>} : vector<1x128xbf16>, vector<128x512xbf16>, vector<1x512xf32> -> vector<1x512xf32>
    %94 = arith.addf %91, %93 : vector<1x512xf32>
    %95 = vector.extract_strided_slice %94 {offsets = [0, 0], sizes = [1, 384], strides = [1, 1]} : vector<1x512xf32> to vector<1x384xf32>
    %96 = arith.negf %95 : vector<1x384xf32>
    %97 = math.exp %96 : vector<1x384xf32>
    %cst_17 = arith.constant 1.000000e+00 : f32
    %98 = vector.broadcast %cst_17 : f32 to vector<1x384xf32>
    %99 = arith.addf %98, %97 : vector<1x384xf32>
    %100 = arith.divf %98, %99 : vector<1x384xf32>
    %101 = vector.extract_strided_slice %94 {offsets = [0, 384], sizes = [1, 128], strides = [1, 1]} : vector<1x512xf32> to vector<1x128xf32>
    %102 = math.tanh %101 : vector<1x128xf32>
    %103 = vector.extract_strided_slice %100 {offsets = [0, 0], sizes = [1, 128], strides = [1, 1]} : vector<1x384xf32> to vector<1x128xf32>
    %104 = vector.extract_strided_slice %100 {offsets = [0, 128], sizes = [1, 128], strides = [1, 1]} : vector<1x384xf32> to vector<1x128xf32>
    %105 = vector.extract_strided_slice %100 {offsets = [0, 256], sizes = [1, 128], strides = [1, 1]} : vector<1x384xf32> to vector<1x128xf32>
    %106 = arith.mulf %104, %88 : vector<1x128xf32>
    %107 = arith.mulf %103, %102 : vector<1x128xf32>
    %108 = arith.addf %106, %107 : vector<1x128xf32>
    %109 = math.tanh %108 : vector<1x128xf32>
    %110 = arith.mulf %105, %109 : vector<1x128xf32>
    %111 = vector.extract_strided_slice %8 {offsets = [5, 0], sizes = [1, 512], strides = [1, 1]} : vector<8x512xf32> to vector<1x512xf32>
    %112 = arith.truncf %110 : vector<1x128xf32> to vector<1x128xbf16>
    %cst_18 = arith.constant dense<0.000000e+00> : vector<1x512xf32>
    %113 = tpu.matmul %112, %2, %cst_18 {dimension_numbers = #tpu.dot_dimension_numbers<[1], [0], [0], [1], [0, 0, 1, 1], [], []>} : vector<1x128xbf16>, vector<128x512xbf16>, vector<1x512xf32> -> vector<1x512xf32>
    %114 = arith.addf %111, %113 : vector<1x512xf32>
    %115 = vector.extract_strided_slice %114 {offsets = [0, 0], sizes = [1, 384], strides = [1, 1]} : vector<1x512xf32> to vector<1x384xf32>
    %116 = arith.negf %115 : vector<1x384xf32>
    %117 = math.exp %116 : vector<1x384xf32>
    %cst_19 = arith.constant 1.000000e+00 : f32
    %118 = vector.broadcast %cst_19 : f32 to vector<1x384xf32>
    %119 = arith.addf %118, %117 : vector<1x384xf32>
    %120 = arith.divf %118, %119 : vector<1x384xf32>
    %121 = vector.extract_strided_slice %114 {offsets = [0, 384], sizes = [1, 128], strides = [1, 1]} : vector<1x512xf32> to vector<1x128xf32>
    %122 = math.tanh %121 : vector<1x128xf32>
    %123 = vector.extract_strided_slice %120 {offsets = [0, 0], sizes = [1, 128], strides = [1, 1]} : vector<1x384xf32> to vector<1x128xf32>
    %124 = vector.extract_strided_slice %120 {offsets = [0, 128], sizes = [1, 128], strides = [1, 1]} : vector<1x384xf32> to vector<1x128xf32>
    %125 = vector.extract_strided_slice %120 {offsets = [0, 256], sizes = [1, 128], strides = [1, 1]} : vector<1x384xf32> to vector<1x128xf32>
    %126 = arith.mulf %124, %108 : vector<1x128xf32>
    %127 = arith.mulf %123, %122 : vector<1x128xf32>
    %128 = arith.addf %126, %127 : vector<1x128xf32>
    %129 = math.tanh %128 : vector<1x128xf32>
    %130 = arith.mulf %125, %129 : vector<1x128xf32>
    %131 = vector.extract_strided_slice %8 {offsets = [6, 0], sizes = [1, 512], strides = [1, 1]} : vector<8x512xf32> to vector<1x512xf32>
    %132 = arith.truncf %130 : vector<1x128xf32> to vector<1x128xbf16>
    %cst_20 = arith.constant dense<0.000000e+00> : vector<1x512xf32>
    %133 = tpu.matmul %132, %2, %cst_20 {dimension_numbers = #tpu.dot_dimension_numbers<[1], [0], [0], [1], [0, 0, 1, 1], [], []>} : vector<1x128xbf16>, vector<128x512xbf16>, vector<1x512xf32> -> vector<1x512xf32>
    %134 = arith.addf %131, %133 : vector<1x512xf32>
    %135 = vector.extract_strided_slice %134 {offsets = [0, 0], sizes = [1, 384], strides = [1, 1]} : vector<1x512xf32> to vector<1x384xf32>
    %136 = arith.negf %135 : vector<1x384xf32>
    %137 = math.exp %136 : vector<1x384xf32>
    %cst_21 = arith.constant 1.000000e+00 : f32
    %138 = vector.broadcast %cst_21 : f32 to vector<1x384xf32>
    %139 = arith.addf %138, %137 : vector<1x384xf32>
    %140 = arith.divf %138, %139 : vector<1x384xf32>
    %141 = vector.extract_strided_slice %134 {offsets = [0, 384], sizes = [1, 128], strides = [1, 1]} : vector<1x512xf32> to vector<1x128xf32>
    %142 = math.tanh %141 : vector<1x128xf32>
    %143 = vector.extract_strided_slice %140 {offsets = [0, 0], sizes = [1, 128], strides = [1, 1]} : vector<1x384xf32> to vector<1x128xf32>
    %144 = vector.extract_strided_slice %140 {offsets = [0, 128], sizes = [1, 128], strides = [1, 1]} : vector<1x384xf32> to vector<1x128xf32>
    %145 = vector.extract_strided_slice %140 {offsets = [0, 256], sizes = [1, 128], strides = [1, 1]} : vector<1x384xf32> to vector<1x128xf32>
    %146 = arith.mulf %144, %128 : vector<1x128xf32>
    %147 = arith.mulf %143, %142 : vector<1x128xf32>
    %148 = arith.addf %146, %147 : vector<1x128xf32>
    %149 = math.tanh %148 : vector<1x128xf32>
    %150 = arith.mulf %145, %149 : vector<1x128xf32>
    %151 = vector.extract_strided_slice %8 {offsets = [7, 0], sizes = [1, 512], strides = [1, 1]} : vector<8x512xf32> to vector<1x512xf32>
    %152 = arith.truncf %150 : vector<1x128xf32> to vector<1x128xbf16>
    %cst_22 = arith.constant dense<0.000000e+00> : vector<1x512xf32>
    %153 = tpu.matmul %152, %2, %cst_22 {dimension_numbers = #tpu.dot_dimension_numbers<[1], [0], [0], [1], [0, 0, 1, 1], [], []>} : vector<1x128xbf16>, vector<128x512xbf16>, vector<1x512xf32> -> vector<1x512xf32>
    %154 = arith.addf %151, %153 : vector<1x512xf32>
    %155 = vector.extract_strided_slice %154 {offsets = [0, 0], sizes = [1, 384], strides = [1, 1]} : vector<1x512xf32> to vector<1x384xf32>
    %156 = arith.negf %155 : vector<1x384xf32>
    %157 = math.exp %156 : vector<1x384xf32>
    %cst_23 = arith.constant 1.000000e+00 : f32
    %158 = vector.broadcast %cst_23 : f32 to vector<1x384xf32>
    %159 = arith.addf %158, %157 : vector<1x384xf32>
    %160 = arith.divf %158, %159 : vector<1x384xf32>
    %161 = vector.extract_strided_slice %154 {offsets = [0, 384], sizes = [1, 128], strides = [1, 1]} : vector<1x512xf32> to vector<1x128xf32>
    %162 = math.tanh %161 : vector<1x128xf32>
    %163 = vector.extract_strided_slice %160 {offsets = [0, 0], sizes = [1, 128], strides = [1, 1]} : vector<1x384xf32> to vector<1x128xf32>
    %164 = vector.extract_strided_slice %160 {offsets = [0, 128], sizes = [1, 128], strides = [1, 1]} : vector<1x384xf32> to vector<1x128xf32>
    %165 = vector.extract_strided_slice %160 {offsets = [0, 256], sizes = [1, 128], strides = [1, 1]} : vector<1x384xf32> to vector<1x128xf32>
    %166 = arith.mulf %164, %148 : vector<1x128xf32>
    %167 = arith.mulf %163, %162 : vector<1x128xf32>
    %168 = arith.addf %166, %167 : vector<1x128xf32>
    %169 = math.tanh %168 : vector<1x128xf32>
    %170 = arith.mulf %165, %169 : vector<1x128xf32>
    %171 = arith.truncf %170 : vector<1x128xf32> to vector<1x128xbf16>
    %c0_24 = arith.constant 0 : index
    %c0_25 = arith.constant 0 : index
    %172 = vector.load %arg4[%c0_24, %c0_25] : memref<128x128xbf16, #tpu.memory_space<vmem>>, vector<128x128xbf16>
    %cst_26 = arith.constant dense<0.000000e+00> : vector<1x128xf32>
    %173 = tpu.matmul %171, %172, %cst_26 {dimension_numbers = #tpu.dot_dimension_numbers<[1], [0], [0], [1], [0, 0, 1, 1], [], []>} : vector<1x128xbf16>, vector<128x128xbf16>, vector<1x128xf32> -> vector<1x128xf32>
    %c0_27 = arith.constant 0 : index
    %c0_28 = arith.constant 0 : index
    %174 = vector.load %arg5[%c0_27, %c0_28] : memref<1x128xf32, #tpu.memory_space<vmem>>, vector<1x128xf32>
    %175 = arith.addf %173, %174 : vector<1x128xf32>
    %c0_29 = arith.constant 0 : index
    %c0_30 = arith.constant 0 : index
    %176 = vector.load %arg6[%c0_29, %c0_30] : memref<1x128xf32, #tpu.memory_space<vmem>>, vector<1x128xf32>
    tpu.vector_store %arg6[%c0_29, %c0_30], %175 {strides = array<i32>} : memref<1x128xf32, #tpu.memory_space<vmem>>, vector<1x128xf32>,
    return
  }
}

</mosaic_0001>

<bundles_post_ra>
// kernel: forward.1
= control target key start
LH: loop header
LB: loop body
LE: loop exit
PB: predicated region body
PF: predicated region fallthrough
CT: control target
= control target key end

     0   :  { %11 = vsyncpa [#allocation3], 0  ;;  %s2364_s0 = inlined_call_operand.vmem [shape: f32[8,1], index: 0, kind: input, shape index: {}]   ;;  %s2365_s1 = inlined_call_operand.vmem [shape: f32[1,512], index: 1, kind: input, shape index: {}]   ;;  %s2366_s2 = inlined_call_operand.hbm [shape: bf16[128,512], index: 2, kind: input, shape index: {}]   ;;  %s2367_s3 = inlined_call_operand.vmem [shape: f32[1,512], index: 3, kind: input, shape index: {}]   ;;  %s2368_s4 = inlined_call_operand.hbm [shape: bf16[128,128], index: 4, kind: input, shape index: {}]   ;;  %s2369_s5 = inlined_call_operand.vmem [shape: f32[1,128], index: 5, kind: input, shape index: {}]   ;;  %s2370_s6 = inlined_call_operand.hbm [shape: f32[1,128], index: 6, kind: output, shape index: {}]  }
   0x1   :  { %12 = vsyncpa [#allocation6], 0 }
   0x2   :  { %13 = vsyncpa [#allocation4], 0  ;;  %s22_s23 = sshll.u32 %s2366_s2, 4  ;;  %s1912_s24 = smov [#allocation2]   ;;  %s23_s23 = int_to_ptr.hbm [resolvable:$true] %s22_s23 }
   0x3   :  { %s24_s25 = sshll.u32 %s1912_s24, 4  ;;  %s37_s28 = sshll.u32 %s2368_s4, 4  ;;  %s25_s25 = int_to_ptr.vmem [resolvable:$true] %s24_s25  ;;  %s38_s28 = int_to_ptr.hbm [resolvable:$true] %s37_s28 }
   0x4   :  { %s1913_s29 = smov 256   ;;  %s1914_s30 = smov 16  }
   0x5   :  { %30 = dma.hbm_to_vmem [thread:$0]  %s23_s23, 4096, %s25_s25, [#allocation3], %s1913_s29, %s1913_s29, %s1914_s30  }
   0x6   :  { %s1915_s7 = smov [#allocation5]   ;;  %s1916_s9 = smov 64  }
   0x7   :  { %s39_s8 = sshll.u32 %s1915_s7, 4  ;;  %s1917_s10 = smov 4   ;;  %s40_s8 = int_to_ptr.vmem [resolvable:$true] %s39_s8 }
   0x8   :  { %45 = dma.hbm_to_vmem [thread:$0]  %s38_s28, 1024, %s40_s8, [#allocation6], %s1916_s9, %s1916_s9, %s1917_s10  }
   0x9   :  { %1906 = dma.done.wait [#allocation3], 4096  }
   0xa   :  { %1907 = vsyncadd [#allocation3], 4294963200 }
   0xb   :  { %1908 = dma.done.wait [#allocation6], 1024  }
   0xc   :  { %1909 = vsyncadd [#allocation6], 4294966272  ;;  %v1587_v0 = vld [vmem:[#allocation2 + $0xe0] sm:$0xf]  ;;  %v1687_v1 = vld [vmem:[#allocation2 + $0xec] sm:$0xf0] }
   0xd   :  { %v1685_v2 = vld [vmem:[#allocation2 + $0xe4] sm:$0xf]  ;;  %v1961_v3 = vor.u32 %v1687_v1, %v1587_v0  ;;  %v1589_v4 = vld [vmem:[#allocation2 + $0xf0] sm:$0xf0]  ;;  %v1595_v5 = vld [vmem:[#allocation2 + $0xe8] sm:$0xf] }
   0xe   :  { %v1688_v6 = vld [vmem:[#allocation2 + $0xf4] sm:$0xf0]  ;;  %v1963_v7 = vor.u32 %v1685_v2, %v1589_v4  ;;  %v1686_v9 = vld [vmem:[#allocation2 + $0xec] sm:$0xf]  ;;  %v1597_v10 = vld [vmem:[#allocation2 + $0xf8] sm:$0xf0] }
   0xf   :  { %v1965_v8 = vor.u32 %v1688_v6, %v1595_v5  ;;  %v1571_v11 = vld [vmem:[#allocation2 + $0xc0] sm:$0xf]  ;;  %283 = vmatpush.bf16.msra.mxu0 %v1961_v3  ;;  %v1968_v12 = vor.u32 %v1686_v9, %v1597_v10  ;;  %v1683_v13 = vld [vmem:[#allocation2 + $0xcc] sm:$0xf0]  ;;  %v1681_v14 = vld [vmem:[#allocation2 + $0xc4] sm:$0xf] }
  0x10   :  { %v1573_v15 = vld [vmem:[#allocation2 + $0xd0] sm:$0xf0]  ;;  %296 = vmatpush.bf16.msra.mxu1 %v1963_v7  ;;  %v1972_v16 = vor.u32 %v1683_v13, %v1571_v11  ;;  %v1579_v18 = vld [vmem:[#allocation2 + $0xc8] sm:$0xf]  ;;  %v1684_v19 = vld [vmem:[#allocation2 + $0xd4] sm:$0xf0] }
  0x11   :  { %309 = vmatpush.bf16.msra.mxu2 %v1965_v8  ;;  %v1974_v17 = vor.u32 %v1681_v14, %v1573_v15  ;;  %v1682_v20 = vld [vmem:[#allocation2 + $0xcc] sm:$0xf]  ;;  %322 = vmatpush.bf16.msra.mxu3 %v1968_v12  ;;  %v1977_v21 = vor.u32 %v1684_v19, %v1579_v18  ;;  %v1581_v22 = vld [vmem:[#allocation2 + $0xd8] sm:$0xf0]  ;;  %v1555_v23 = vld [vmem:[#allocation2 + $0xa0] sm:$0xf] }
  0x12   :  { %v1679_v24 = vld [vmem:[#allocation2 + $0xac] sm:$0xf0]  ;;  %v1979_v25 = vor.u32 %v1682_v20, %v1581_v22  ;;  %v1677_v26 = vld [vmem:[#allocation2 + $0xa4] sm:$0xf]  ;;  %v1557_v27 = vld [vmem:[#allocation2 + $0xb0] sm:$0xf0] }
  0x13   :  { %v1563_v28 = vld [vmem:[#allocation2 + $0xa8] sm:$0xf]  ;;  %284 = vmatpush.bf16.msra.mxu0 %v1972_v16  ;;  %v1982_v29 = vor.u32 %v1679_v24, %v1555_v23  ;;  %v1680_v30 = vld [vmem:[#allocation2 + $0xb4] sm:$0xf0]  ;;  %v1678_v31 = vld [vmem:[#allocation2 + $0xac] sm:$0xf]  ;;  %v1986_v33 = vor.u32 %v1677_v26, %v1557_v27 }
  0x14   :  { %v1565_v32 = vld [vmem:[#allocation2 + $0xb8] sm:$0xf0]  ;;  %297 = vmatpush.bf16.msra.mxu1 %v1974_v17  ;;  %v1988_v34 = vor.u32 %v1680_v30, %v1563_v28  ;;  %v1539_v35 = vld [vmem:[#allocation2 + $0x80] sm:$0xf]  ;;  %v1675_v36 = vld [vmem:[#allocation2 + $0x8c] sm:$0xf0] }
  0x15   :  { %310 = vmatpush.bf16.msra.mxu2 %v1977_v21  ;;  %v1673_v37 = vld [vmem:[#allocation2 + $0x84] sm:$0xf]  ;;  %323 = vmatpush.bf16.msra.mxu3 %v1979_v25  ;;  %v1991_v38 = vor.u32 %v1678_v31, %v1565_v32  ;;  %v1541_v39 = vld [vmem:[#allocation2 + $0x90] sm:$0xf0]  ;;  %v1547_v40 = vld [vmem:[#allocation2 + $0x88] sm:$0xf]  ;;  %v1994_v44 = vor.u32 %v1675_v36, %v1539_v35 }
  0x16   :  { %v1676_v41 = vld [vmem:[#allocation2 + $0x94] sm:$0xf0]  ;;  %v1674_v42 = vld [vmem:[#allocation2 + $0x8c] sm:$0xf]  ;;  %v1549_v43 = vld [vmem:[#allocation2 + $0x98] sm:$0xf0]  ;;  %v1998_v45 = vor.u32 %v1673_v37, %v1541_v39 }
  0x17   :  { %285 = vmatpush.bf16.msra.mxu0 %v1982_v29  ;;  %v2000_v46 = vor.u32 %v1676_v41, %v1547_v40  ;;  %v1523_v47 = vld [vmem:[#allocation2 + $0x60] sm:$0xf]  ;;  %v1671_v48 = vld [vmem:[#allocation2 + $0x6c] sm:$0xf0]  ;;  %v1669_v49 = vld [vmem:[#allocation2 + $0x64] sm:$0xf]  ;;  %v2003_v50 = vor.u32 %v1674_v42, %v1549_v43 }
  0x18   :  { %298 = vmatpush.bf16.msra.mxu1 %v1986_v33  ;;  %v1525_v51 = vld [vmem:[#allocation2 + $0x70] sm:$0xf0]  ;;  %v1531_v52 = vld [vmem:[#allocation2 + $0x68] sm:$0xf]  ;;  %v1672_v53 = vld [vmem:[#allocation2 + $0x74] sm:$0xf0]  ;;  %v2006_v56 = vor.u32 %v1671_v48, %v1523_v47 }
  0x19   :  { %311 = vmatpush.bf16.msra.mxu2 %v1988_v34  ;;  %324 = vmatpush.bf16.msra.mxu3 %v1991_v38  ;;  %v1670_v54 = vld [vmem:[#allocation2 + $0x6c] sm:$0xf]  ;;  %v1533_v55 = vld [vmem:[#allocation2 + $0x78] sm:$0xf0]  ;;  %v2010_v57 = vor.u32 %v1669_v49, %v1525_v51  ;;  %v2012_v58 = vor.u32 %v1672_v53, %v1531_v52  ;;  %v1507_v59 = vld [vmem:[#allocation2 + $0x40] sm:$0xf] }
  0x1a   :  { %v1667_v60 = vld [vmem:[#allocation2 + $0x4c] sm:$0xf0]  ;;  %v1665_v61 = vld [vmem:[#allocation2 + $0x44] sm:$0xf]  ;;  %v2015_v62 = vor.u32 %v1670_v54, %v1533_v55  ;;  %v1509_v63 = vld [vmem:[#allocation2 + $0x50] sm:$0xf0] }
  0x1b   :  { %286 = vmatpush.bf16.msra.mxu0 %v1994_v44  ;;  %v1515_v0 = vld [vmem:[#allocation2 + $0x48] sm:$0xf]  ;;  %v1668_v1 = vld [vmem:[#allocation2 + $0x54] sm:$0xf0]  ;;  %v1666_v2 = vld [vmem:[#allocation2 + $0x4c] sm:$0xf]  ;;  %v2018_v5 = vor.u32 %v1667_v60, %v1507_v59  ;;  %v2022_v9 = vor.u32 %v1665_v61, %v1509_v63 }
  0x1c   :  { %299 = vmatpush.bf16.msra.mxu1 %v1998_v45  ;;  %v1517_v4 = vld [vmem:[#allocation2 + $0x58] sm:$0xf0]  ;;  %v1491_v6 = vld [vmem:[#allocation2 + $0x20] sm:$0xf]  ;;  %v2024_v10 = vor.u32 %v1668_v1, %v1515_v0  ;;  %v1663_v11 = vld [vmem:[#allocation2 + $0x2c] sm:$0xf0] }
  0x1d   :  { %312 = vmatpush.bf16.msra.mxu2 %v2000_v46  ;;  %325 = vmatpush.bf16.msra.mxu3 %v2003_v50  ;;  %v1661_v13 = vld [vmem:[#allocation2 + $0x24] sm:$0xf]  ;;  %v1493_v14 = vld [vmem:[#allocation2 + $0x30] sm:$0xf0]  ;;  %v2027_v15 = vor.u32 %v1666_v2, %v1517_v4  ;;  %v1499_v18 = vld [vmem:[#allocation2 + $0x28] sm:$0xf]  ;;  %v2033_v26 = vor.u32 %v1663_v11, %v1491_v6 }
  0x1e   :  { %v1664_v19 = vld [vmem:[#allocation2 + $0x34] sm:$0xf0]  ;;  %v57_v20 = vld [vmem:[%s2364_s0] sm:$0xff]  ;;  %v1662_v22 = vld [vmem:[#allocation2 + $0x2c] sm:$0xf]  ;;  %v1918_v24 = vmov 0   ;;  %v2037_v27 = vor.u32 %v1661_v13, %v1493_v14 }
  0x1f   :  { %287 = vmatpush.bf16.msra.mxu0 %v2006_v56  ;;  %v1501_v23 = vld [vmem:[#allocation2 + $0x38] sm:$0xf0]  ;;  %1705 = vset.pattern.permute.xlu0 %v1918_v24  ;;  %v2039_v28 = vor.u32 %v1664_v19, %v1499_v18  ;;  %v1475_v30 = vld [vmem:[#allocation2] sm:$0xf]  ;;  %v1659_v31 = vld [vmem:[#allocation2 + $0xc] sm:$0xf0] }
  0x20   :  { %300 = vmatpush.bf16.msra.mxu1 %v2010_v57  ;;  %93 = vperm.xlu0 %1705, %v57_v20   ;;  %v1657_v32 = vld [vmem:[#allocation2 + $0x4] sm:$0xf]  ;;  %v2042_v35 = vor.u32 %v1662_v22, %v1501_v23  ;;  %v1477_v36 = vld [vmem:[#allocation2 + $0x10] sm:$0xf0]  ;;  %v1483_v37 = vld [vmem:[#allocation2 + $0x8] sm:$0xf]  ;;  %v2045_v42 = vor.u32 %v1659_v31, %v1475_v30 }
  0x21   :  { %313 = vmatpush.bf16.msra.mxu2 %v2012_v58  ;;  %326 = vmatpush.bf16.msra.mxu3 %v2015_v62  ;;  %v1660_v39 = vld [vmem:[#allocation2 + $0x14] sm:$0xf0]  ;;  %v1658_v40 = vld [vmem:[#allocation2 + $0xc] sm:$0xf]  ;;  %v1485_v41 = vld [vmem:[#allocation2 + $0x18] sm:$0xf0]  ;;  %v2049_v43 = vor.u32 %v1657_v32, %v1477_v36 }
  0x22   :  { %v2051_v47 = vor.u32 %v1660_v39, %v1483_v37  ;;  %v2054_v48 = vor.u32 %v1658_v40, %v1485_v41  ;;  %v58_v49 = vld [vmem:[%s2365_s1] sm:$0xf]  ;;  %s1919_s14 = smov [#allocation7]   ;;  %s1462_s18 = sshll.u32 %s2370_s6, 4  ;;  %s1463_s18 = int_to_ptr.hbm [resolvable:$true] %s1462_s18 }
  0x23   :  { %288 = vmatpush.bf16.msra.mxu0 %v2018_v5  ;;  %v97_v51 = vperm.slane %v58_v49, 0  ;;  %v98_v52 = vperm.slane %v58_v49, 1  ;;  %v109_v53 = vld [vmem:[%s2367_s3] sm:$0xf]  ;;  %v99_v0 = vperm.slane %v58_v49, 2  ;;  %v100_v32 = vperm.slane %v58_v49, 3 }
  0x24   :  { %301 = vmatpush.bf16.msra.mxu1 %v2022_v9  ;;  %v111_v55 = vperm.slane %v109_v53, 0  ;;  %v112_v60 = vperm.slane %v109_v53, 1  ;;  %v113_v11 = vperm.slane %v109_v53, 2  ;;  %s1460_s15 = sshll.u32 %s1919_s14, 4  ;;  %s1461_s15 = int_to_ptr.vmem [resolvable:$true] %s1460_s15 }
  0x25   :  { %314 = vmatpush.bf16.msra.mxu2 %v2024_v10  ;;  %327 = vmatpush.bf16.msra.mxu3 %v2027_v15 }
  0x27   :  { %289 = vmatpush.bf16.msra.mxu0 %v2033_v26 }
  0x28   :  { %302 = vmatpush.bf16.msra.mxu1 %v2037_v27 }
  0x29   :  { %315 = vmatpush.bf16.msra.mxu2 %v2039_v28  ;;  %328 = vmatpush.bf16.msra.mxu3 %v2042_v35 }
  0x2b   :  { %290 = vmatpush.bf16.msra.mxu0 %v2045_v42 }
  0x2c   :  { %303 = vmatpush.bf16.msra.mxu1 %v2049_v43 }
  0x2d   :  { %316 = vmatpush.bf16.msra.mxu2 %v2051_v47  ;;  %329 = vmatpush.bf16.msra.mxu3 %v2054_v48 }
  0x2e   :  { %291 = vmatmul.bf16.vlgmr.msra.gmra.mxu0 %v1918_v24 }
  0x2f   :  { %403 = vmatpush.bf16.msrb.mxu0 %v1961_v3  ;;  %304 = vmatmul.bf16.vlgmr.msra.gmra.mxu1 %v1918_v24 }
  0x30   :  { %416 = vmatpush.bf16.msrb.mxu1 %v1963_v7  ;;  %317 = vmatmul.bf16.vlgmr.msra.gmra.mxu2 %v1918_v24 }
  0x31   :  { %330 = vmatmul.bf16.vlgmr.msra.gmra.mxu3 %v1918_v24  ;;  %429 = vmatpush.bf16.msrb.mxu2 %v1965_v8 }
  0x32   :  { %442 = vmatpush.bf16.msrb.mxu3 %v1968_v12 }
  0x33   :  { %404 = vmatpush.bf16.msrb.mxu0 %v1972_v16 }
  0x34   :  { %417 = vmatpush.bf16.msrb.mxu1 %v1974_v17 }
  0x35   :  { %430 = vmatpush.bf16.msrb.mxu2 %v1977_v21 }
  0x36   :  { %443 = vmatpush.bf16.msrb.mxu3 %v1979_v25 }
  0x37   :  { %405 = vmatpush.bf16.msrb.mxu0 %v1982_v29 }
  0x38   :  { %418 = vmatpush.bf16.msrb.mxu1 %v1986_v33 }
  0x39   :  { %431 = vmatpush.bf16.msrb.mxu2 %v1988_v34 }
  0x3a   :  { %444 = vmatpush.bf16.msrb.mxu3 %v1991_v38 }
  0x3b   :  { %406 = vmatpush.bf16.msrb.mxu0 %v1994_v44 }
  0x3c   :  { %419 = vmatpush.bf16.msrb.mxu1 %v1998_v45 }
  0x3d   :  { %432 = vmatpush.bf16.msrb.mxu2 %v2000_v46 }
  0x3e   :  { %445 = vmatpush.bf16.msrb.mxu3 %v2003_v50 }
  0x3f   :  { %407 = vmatpush.bf16.msrb.mxu0 %v2006_v56 }
  0x40   :  { %420 = vmatpush.bf16.msrb.mxu1 %v2010_v57 }
  0x41   :  { %433 = vmatpush.bf16.msrb.mxu2 %v2012_v58 }
  0x42   :  { %446 = vmatpush.bf16.msrb.mxu3 %v2015_v62 }
  0x43   :  { %408 = vmatpush.bf16.msrb.mxu0 %v2018_v5 }
  0x44   :  { %421 = vmatpush.bf16.msrb.mxu1 %v2022_v9 }
  0x45   :  { %434 = vmatpush.bf16.msrb.mxu2 %v2024_v10 }
  0x46   :  { %447 = vmatpush.bf16.msrb.mxu3 %v2027_v15 }
  0x47   :  { %409 = vmatpush.bf16.msrb.mxu0 %v2033_v26 }
  0x48   :  { %422 = vmatpush.bf16.msrb.mxu1 %v2037_v27 }
  0x49   :  { %435 = vmatpush.bf16.msrb.mxu2 %v2039_v28 }
  0x4a   :  { %448 = vmatpush.bf16.msrb.mxu3 %v2042_v35 }
  0x4b   :  { %410 = vmatpush.bf16.msrb.mxu0 %v2045_v42 }
  0x4c   :  { %423 = vmatpush.bf16.msrb.mxu1 %v2049_v43 }
  0x4d   :  { %436 = vmatpush.bf16.msrb.mxu2 %v2051_v47 }
  0x4e   :  { %449 = vmatpush.bf16.msrb.mxu3 %v2054_v48 }
  0x4f   :  { %542 = vmatpush.bf16.msra.mxu0 %v1961_v3 }
  0x50   :  { %555 = vmatpush.bf16.msra.mxu1 %v1963_v7 }
  0x51   :  { %568 = vmatpush.bf16.msra.mxu2 %v1965_v8 }
  0x52   :  { %581 = vmatpush.bf16.msra.mxu3 %v1968_v12 }
  0x53   :  { %543 = vmatpush.bf16.msra.mxu0 %v1972_v16 }
  0x54   :  { %556 = vmatpush.bf16.msra.mxu1 %v1974_v17 }
  0x55   :  { %569 = vmatpush.bf16.msra.mxu2 %v1977_v21 }
  0x56   :  { %582 = vmatpush.bf16.msra.mxu3 %v1979_v25 }
  0x57   :  { %544 = vmatpush.bf16.msra.mxu0 %v1982_v29 }
  0x58   :  { %557 = vmatpush.bf16.msra.mxu1 %v1986_v33 }
  0x59   :  { %570 = vmatpush.bf16.msra.mxu2 %v1988_v34 }
  0x5a   :  { %583 = vmatpush.bf16.msra.mxu3 %v1991_v38 }
  0x5b   :  { %545 = vmatpush.bf16.msra.mxu0 %v1994_v44 }
  0x5c   :  { %558 = vmatpush.bf16.msra.mxu1 %v1998_v45 }
  0x5d   :  { %571 = vmatpush.bf16.msra.mxu2 %v2000_v46 }
  0x5e   :  { %584 = vmatpush.bf16.msra.mxu3 %v2003_v50 }
  0x5f   :  { %546 = vmatpush.bf16.msra.mxu0 %v2006_v56 }
  0x60   :  { %559 = vmatpush.bf16.msra.mxu1 %v2010_v57 }
  0x61   :  { %572 = vmatpush.bf16.msra.mxu2 %v2012_v58 }
  0x62   :  { %585 = vmatpush.bf16.msra.mxu3 %v2015_v62 }
  0x63   :  { %547 = vmatpush.bf16.msra.mxu0 %v2018_v5 }
  0x64   :  { %560 = vmatpush.bf16.msra.mxu1 %v2022_v9 }
  0x65   :  { %573 = vmatpush.bf16.msra.mxu2 %v2024_v10 }
  0x66   :  { %586 = vmatpush.bf16.msra.mxu3 %v2027_v15 }
  0x67   :  { %548 = vmatpush.bf16.msra.mxu0 %v2033_v26 }
  0x68   :  { %561 = vmatpush.bf16.msra.mxu1 %v2037_v27 }
  0x69   :  { %574 = vmatpush.bf16.msra.mxu2 %v2039_v28 }
  0x6a   :  { %587 = vmatpush.bf16.msra.mxu3 %v2042_v35 }
  0x6b   :  { %549 = vmatpush.bf16.msra.mxu0 %v2045_v42 }
  0x6c   :  { %562 = vmatpush.bf16.msra.mxu1 %v2049_v43 }
  0x6d   :  { %575 = vmatpush.bf16.msra.mxu2 %v2051_v47 }
  0x6e   :  { %588 = vmatpush.bf16.msra.mxu3 %v2054_v48 }
  0x92   :  { %v94_v54 = vpop.permute.xlu0 %93 }
  0x93   :  { %v105_v59 = vmul.f32 %v97_v51, %v94_v54  ;;  %v106_v61 = vmul.f32 %v98_v52, %v94_v54  ;;  %v107_v13 = vmul.f32 %v99_v0, %v94_v54  ;;  %v114_v51 = vperm.slane %v109_v53, 3 }
  0x94   :  { %v108_v52 = vmul.f32 %v100_v32, %v94_v54 }
  0x95   :  { %v2130_v63 = vadd.f32 %v111_v55, %v105_v59  ;;  %v2132_v1 = vadd.f32 %v112_v60, %v106_v61  ;;  %v2136_v20 = vadd.f32 %v113_v11, %v107_v13 }
  0x96   :  { %v2139_v61 = vadd.f32 %v114_v51, %v108_v52 }
  0xab   :  { %v292_v2 = vpop.f32.mrf.mxu0 }
  0xac   :  { %v335_v4 = vadd.f32 %v292_v2, %v2130_v63  ;;  %v305_v6 = vpop.f32.mrf.mxu1 }
  0xad   :  { %v336_v14 = vadd.f32 %v305_v6, %v2132_v1 }
  0xae   :  { %v1601_v18 = vmul.f32 -1.442695, %v335_v4 }
  0xaf   :  { %v1602_v19 = vmul.f32 -1.442695, %v336_v14 }
  0xb0   :  { %1706 = vpow2.f32 %v1601_v18 }
  0xb1   :  { %1708 = vpow2.f32 %v1602_v19 }
  0xb3   :  { %v318_v22 = vpop.f32.mrf.mxu2  ;;  %v294_v30 = vpop.f32.mrf.mxu0 }
  0xb4   :  { %v337_v23 = vadd.f32 %v318_v22, %v2136_v20  ;;  %v331_v24 = vpop.f32.mrf.mxu3  ;;  %v307_v31 = vpop.f32.mrf.mxu1 }
  0xb5   :  { %v338_v4 = vadd.f32 %v331_v24, %v2139_v61 }
  0xb6   :  { %v1603_v36 = vmul.f32 -1.442695, %v337_v23  ;;  %v1707_v37 = vpop.eup %1706 }
  0xb7   :  { %v1709_v39 = vpop.eup %1708  ;;  %v348_v40 = vadd.f32 1.0, %v1707_v37 }
  0xb8   :  { %1710 = vpow2.f32 %v1603_v36  ;;  %v349_v41 = vadd.f32 1.0, %v1709_v39 }
  0xb9   :  { %1712 = vrcp.f32 %v348_v40  ;;  %v362_v18 = vand.u32 2147483648, %v348_v40  ;;  %v360_v19 = vand.u32 2147483647, %v348_v40  ;;  %vm356_vm2 = vweird.f32 %v348_v40 }
  0xba   :  { %1714 = vrcp.f32 %v349_v41  ;;  %v377_v53 = vand.u32 2147483648, %v349_v41  ;;  %v375_v23 = vand.u32 2147483647, %v349_v41  ;;  %vm371_vm3 = vweird.f32 %v349_v41 }
  0xbb   :  { %v320_v55 = vpop.f32.mrf.mxu2  ;;  %v363_v32 = vor.u32 1.1754944e-38, %v362_v18  ;;  %vm361_vm5 = vcmp.eq.f32.partialorder %v360_v19, 8.507059e+37 }
  0xbc   :  { %v333_v59 = vpop.f32.mrf.mxu3  ;;  %v378_v37 = vor.u32 1.1754944e-38, %v377_v53  ;;  %vm376_vm7 = vcmp.eq.f32.partialorder %v375_v23, 8.507059e+37 }
  0xbe   :  { %v1711_v60 = vpop.eup %1710 }
  0xbf   :  { %v350_v0 = vadd.f32 1.0, %v1711_v60  ;;  %v1713_v2 = vpop.eup %1712 }
  0xc0   :  { %v1715_v49 = vpop.eup %1714  ;;  %v352_v6 = vmul.f32 %v1713_v2, %v348_v40  ;;  %vm357_vm0 = vweird.f32 %v1713_v2 }
  0xc1   :  { %1716 = vrcp.f32 %v350_v0  ;;  %v367_v11 = vmul.f32 %v1715_v49, %v349_v41  ;;  %vm372_vm1 = vweird.f32 %v1715_v49  ;;  %vm358_vm4 = vmor %vm356_vm2, %vm357_vm0  ;;  %v392_v41 = vand.u32 2147483648, %v350_v0 }
  0xc2   :  { %v353_v13 = vsub.f32 1.0, %v352_v6  ;;  %1718 = vtanh.f32 %v338_v4  ;;  %vm373_vm6 = vmor %vm371_vm3, %vm372_vm1  ;;  %vm386_vm9 = vweird.f32 %v350_v0 }
  0xc3   :  { %v368_v14 = vsub.f32 1.0, %v367_v11  ;;  %v393_v18 = vor.u32 1.1754944e-38, %v392_v41 }
  0xc4   :  { %v354_v54 = vmul.f32 %v1713_v2, %v353_v13 }
  0xc5   :  { %v369_v22 = vmul.f32 %v1715_v49, %v368_v14 }
  0xc6   :  { %v355_v31 = vadd.f32 %v1713_v2, %v354_v54 }
  0xc7   :  { %v1717_v30 = vpop.eup %1716  ;;  %v370_v36 = vadd.f32 %v1715_v49, %v369_v22 }
  0xc8   :  { %v382_v24 = vmul.f32 %v1717_v30, %v350_v0  ;;  %v359_v39 = vsel %vm358_vm4, %v1713_v2, %v355_v31  ;;  %v1719_v51 = vpop.eup %1718  ;;  %vm387_vm8 = vweird.f32 %v1717_v30  ;;  %v390_v2 = vand.u32 2147483647, %v350_v0 }
  0xc9   :  { %v364_v55 = vsel %vm361_vm5, %v363_v32, %v359_v39  ;;  %v374_v59 = vsel %vm373_vm6, %v1715_v49, %v370_v36  ;;  %vm388_vm10 = vmor %vm386_vm9, %vm387_vm8 }
  0xca   :  { %v383_v52 = vsub.f32 1.0, %v382_v24  ;;  %v379_v60 = vsel %vm376_vm7, %v378_v37, %v374_v59  ;;  %v398_v4 = vmul.f32 %v1719_v51, %v364_v55  ;;  %vm391_vm11 = vcmp.eq.f32.partialorder %v390_v2, 8.507059e+37 }
  0xcb   :  { %v397_v6 = vmul.f32 0.0, %v379_v60 }
  0xcc   :  { %v384_v11 = vmul.f32 %v1717_v30, %v383_v52 }
  0xcd   :  { %v2142_v13 = vadd.f32 %v398_v4, %v397_v6 }
  0xce   :  { %v385_v40 = vadd.f32 %v1717_v30, %v384_v11 }
  0xcf   :  { %1720 = vtanh.f32 %v2142_v13 }
  0xd0   :  { %v389_v14 = vsel %vm388_vm10, %v1717_v30, %v385_v40 }
  0xd1   :  { %v394_v49 = vsel %vm391_vm11, %v393_v18, %v389_v14 }
  0xd5   :  { %v1721_v53 = vpop.eup %1720 }
  0xd6   :  { %v401_v54 = vmul.f32 %v1721_v53, %v394_v49 }
  0xd8   :  { %v402_v19 = vpack.c.bf16 %v401_v54, %v401_v54 }
  0xda   :  { %411 = vmatmul.bf16.vlgmr.msrb.gmra.mxu0 %v402_v19  ;;  %424 = vmatmul.bf16.vlgmr.msrb.gmra.mxu1 %v402_v19 }
  0xdb   :  { %437 = vmatmul.bf16.vlgmr.msrb.gmra.mxu2 %v402_v19  ;;  %450 = vmatmul.bf16.vlgmr.msrb.gmra.mxu3 %v402_v19 }
  0xdc   :  { %680 = vmatpush.bf16.msrb.mxu0 %v1961_v3  ;;  %693 = vmatpush.bf16.msrb.mxu1 %v1963_v7 }
  0xdd   :  { %706 = vmatpush.bf16.msrb.mxu2 %v1965_v8  ;;  %719 = vmatpush.bf16.msrb.mxu3 %v1968_v12 }
  0xe0   :  { %681 = vmatpush.bf16.msrb.mxu0 %v1972_v16  ;;  %694 = vmatpush.bf16.msrb.mxu1 %v1974_v17 }
  0xe1   :  { %707 = vmatpush.bf16.msrb.mxu2 %v1977_v21  ;;  %720 = vmatpush.bf16.msrb.mxu3 %v1979_v25 }
  0xe4   :  { %682 = vmatpush.bf16.msrb.mxu0 %v1982_v29  ;;  %695 = vmatpush.bf16.msrb.mxu1 %v1986_v33 }
  0xe5   :  { %708 = vmatpush.bf16.msrb.mxu2 %v1988_v34  ;;  %721 = vmatpush.bf16.msrb.mxu3 %v1991_v38 }
  0xe8   :  { %683 = vmatpush.bf16.msrb.mxu0 %v1994_v44  ;;  %696 = vmatpush.bf16.msrb.mxu1 %v1998_v45 }
  0xe9   :  { %709 = vmatpush.bf16.msrb.mxu2 %v2000_v46  ;;  %722 = vmatpush.bf16.msrb.mxu3 %v2003_v50 }
  0xec   :  { %684 = vmatpush.bf16.msrb.mxu0 %v2006_v56  ;;  %697 = vmatpush.bf16.msrb.mxu1 %v2010_v57 }
  0xed   :  { %710 = vmatpush.bf16.msrb.mxu2 %v2012_v58  ;;  %723 = vmatpush.bf16.msrb.mxu3 %v2015_v62 }
  0xf0   :  { %685 = vmatpush.bf16.msrb.mxu0 %v2018_v5  ;;  %698 = vmatpush.bf16.msrb.mxu1 %v2022_v9 }
  0xf1   :  { %711 = vmatpush.bf16.msrb.mxu2 %v2024_v10  ;;  %724 = vmatpush.bf16.msrb.mxu3 %v2027_v15 }
  0xf4   :  { %686 = vmatpush.bf16.msrb.mxu0 %v2033_v26  ;;  %699 = vmatpush.bf16.msrb.mxu1 %v2037_v27 }
  0xf5   :  { %712 = vmatpush.bf16.msrb.mxu2 %v2039_v28  ;;  %725 = vmatpush.bf16.msrb.mxu3 %v2042_v35 }
  0xf8   :  { %687 = vmatpush.bf16.msrb.mxu0 %v2045_v42  ;;  %700 = vmatpush.bf16.msrb.mxu1 %v2049_v43 }
  0xf9   :  { %713 = vmatpush.bf16.msrb.mxu2 %v2051_v47  ;;  %726 = vmatpush.bf16.msrb.mxu3 %v2054_v48 }
 0x157   :  { %v412_v0 = vpop.f32.mrf.mxu0  ;;  %v425_v22 = vpop.f32.mrf.mxu1 }
 0x158   :  { %v459_v23 = vrot.slane %v412_v0, 7  ;;  %v460_v30 = vrot.slane %v425_v22, 7 }
 0x15a   :  { %v467_v31 = vadd.f32 %v459_v23, %v2130_v63  ;;  %v468_v24 = vadd.f32 %v460_v30, %v2132_v1 }
 0x15c   :  { %v1604_v32 = vmul.f32 -1.442695, %v467_v31  ;;  %v1605_v36 = vmul.f32 -1.442695, %v468_v24 }
 0x15e   :  { %1722 = vpow2.f32 %v1604_v32  ;;  %v438_v37 = vpop.f32.mrf.mxu2  ;;  %v451_v39 = vpop.f32.mrf.mxu3 }
 0x15f   :  { %1724 = vpow2.f32 %v1605_v36  ;;  %v461_v51 = vrot.slane %v438_v37, 7  ;;  %v414_v52 = vpop.f32.mrf.mxu0  ;;  %v427_v55 = vpop.f32.mrf.mxu1  ;;  %v462_v14 = vrot.slane %v451_v39, 7 }
 0x161   :  { %v469_v59 = vadd.f32 %v461_v51, %v2136_v20  ;;  %v470_v54 = vadd.f32 %v462_v14, %v2139_v61 }
 0x163   :  { %v1606_v60 = vmul.f32 -1.442695, %v469_v59 }
 0x164   :  { %v1723_v4 = vpop.eup %1722 }
 0x165   :  { %v1725_v6 = vpop.eup %1724  ;;  %v480_v11 = vadd.f32 1.0, %v1723_v4  ;;  %1726 = vpow2.f32 %v1606_v60  ;;  %v530_v4 = vrot.slane %v2142_v13, 7 }
 0x166   :  { %v481_v40 = vadd.f32 1.0, %v1725_v6  ;;  %v440_v41 = vpop.f32.mrf.mxu2  ;;  %v453_v2 = vpop.f32.mrf.mxu3 }
 0x167   :  { %1728 = vrcp.f32 %v480_v11  ;;  %v494_v31 = vand.u32 2147483648, %v480_v11  ;;  %v492_v36 = vand.u32 2147483647, %v480_v11  ;;  %vm488_vm14 = vweird.f32 %v480_v11 }
 0x168   :  { %1730 = vrcp.f32 %v481_v40  ;;  %v509_v24 = vand.u32 2147483648, %v481_v40  ;;  %v507_v39 = vand.u32 2147483647, %v481_v40  ;;  %vm503_vm15 = vweird.f32 %v481_v40 }
 0x169   :  { %v495_v59 = vor.u32 1.1754944e-38, %v494_v31  ;;  %vm493_vm2 = vcmp.eq.f32.partialorder %v492_v36, 8.507059e+37 }
 0x16a   :  { %v510_v6 = vor.u32 1.1754944e-38, %v509_v24  ;;  %vm508_vm3 = vcmp.eq.f32.partialorder %v507_v39, 8.507059e+37 }
 0x16b   :  { %v1727_v18 = vpop.eup %1726 }
 0x16c   :  { %v482_v53 = vadd.f32 1.0, %v1727_v18 }
 0x16d   :  { %v1729_v49 = vpop.eup %1728 }
 0x16e   :  { %v1731_v19 = vpop.eup %1730  ;;  %v484_v0 = vmul.f32 %v1729_v49, %v480_v11  ;;  %1732 = vrcp.f32 %v482_v53  ;;  %vm489_vm12 = vweird.f32 %v1729_v49  ;;  %v524_v13 = vand.u32 2147483648, %v482_v53 }
 0x16f   :  { %v499_v22 = vmul.f32 %v1731_v19, %v481_v40  ;;  %1734 = vtanh.f32 %v470_v54  ;;  %vm504_vm13 = vweird.f32 %v1731_v19  ;;  %vm490_vm0 = vmor %vm488_vm14, %vm489_vm12  ;;  %vm518_vm5 = vweird.f32 %v482_v53 }
 0x170   :  { %v485_v23 = vsub.f32 1.0, %v484_v0  ;;  %vm505_vm1 = vmor %vm503_vm15, %vm504_vm13  ;;  %v522_v31 = vand.u32 2147483647, %v482_v53  ;;  %v525_v24 = vor.u32 1.1754944e-38, %v524_v13 }
 0x171   :  { %v500_v30 = vsub.f32 1.0, %v499_v22 }
 0x172   :  { %v486_v32 = vmul.f32 %v1729_v49, %v485_v23  ;;  %vm523_vm7 = vcmp.eq.f32.partialorder %v522_v31, 8.507059e+37 }
 0x173   :  { %v501_v37 = vmul.f32 %v1731_v19, %v500_v30 }
 0x174   :  { %v1733_v51 = vpop.eup %1732  ;;  %v487_v52 = vadd.f32 %v1729_v49, %v486_v32 }
 0x175   :  { %v514_v55 = vmul.f32 %v1733_v51, %v482_v53  ;;  %v502_v60 = vadd.f32 %v1731_v19, %v501_v37  ;;  %v1735_v2 = vpop.eup %1734  ;;  %vm519_vm4 = vweird.f32 %v1733_v51 }
 0x176   :  { %v491_v41 = vsel %vm490_vm0, %v1729_v49, %v487_v52  ;;  %vm520_vm6 = vmor %vm518_vm5, %vm519_vm4 }
 0x177   :  { %v515_v14 = vsub.f32 1.0, %v514_v55  ;;  %v496_v18 = vsel %vm493_vm2, %v495_v59, %v491_v41  ;;  %v506_v54 = vsel %vm505_vm1, %v1731_v19, %v502_v60 }
 0x178   :  { %v511_v0 = vsel %vm508_vm3, %v510_v6, %v506_v54  ;;  %v533_v22 = vmul.f32 %v1735_v2, %v496_v18 }
 0x179   :  { %v532_v23 = vmul.f32 %v530_v4, %v511_v0  ;;  %v516_v11 = vmul.f32 %v1733_v51, %v515_v14 }
 0x17b   :  { %v2182_v40 = vadd.f32 %v533_v22, %v532_v23  ;;  %v517_v30 = vadd.f32 %v1733_v51, %v516_v11 }
 0x17d   :  { %1736 = vtanh.f32 %v2182_v40  ;;  %v521_v49 = vsel %vm520_vm6, %v1733_v51, %v517_v30 }
 0x17e   :  { %v526_v19 = vsel %vm523_vm7, %v525_v24, %v521_v49 }
 0x183   :  { %v1737_v32 = vpop.eup %1736 }
 0x184   :  { %v536_v36 = vmul.f32 %v1737_v32, %v526_v19 }
 0x186   :  { %v537_v37 = vpack.c.bf16 %v536_v36, %v536_v36 }
 0x188   :  { %v539_v39 = vshrl.u32 %v537_v37, 16 }
 0x18a   :  { %550 = vmatmul.bf16.vlgmr.msra.gmra.mxu0 %v539_v39  ;;  %563 = vmatmul.bf16.vlgmr.msra.gmra.mxu1 %v539_v39 }
 0x18b   :  { %576 = vmatmul.bf16.vlgmr.msra.gmra.mxu2 %v539_v39  ;;  %589 = vmatmul.bf16.vlgmr.msra.gmra.mxu3 %v539_v39 }
 0x18c   :  { %820 = vmatpush.bf16.msra.mxu0 %v1961_v3  ;;  %833 = vmatpush.bf16.msra.mxu1 %v1963_v7 }
 0x18d   :  { %846 = vmatpush.bf16.msra.mxu2 %v1965_v8  ;;  %859 = vmatpush.bf16.msra.mxu3 %v1968_v12 }
 0x190   :  { %821 = vmatpush.bf16.msra.mxu0 %v1972_v16  ;;  %834 = vmatpush.bf16.msra.mxu1 %v1974_v17 }
 0x191   :  { %847 = vmatpush.bf16.msra.mxu2 %v1977_v21  ;;  %860 = vmatpush.bf16.msra.mxu3 %v1979_v25 }
 0x194   :  { %822 = vmatpush.bf16.msra.mxu0 %v1982_v29  ;;  %835 = vmatpush.bf16.msra.mxu1 %v1986_v33 }
 0x195   :  { %848 = vmatpush.bf16.msra.mxu2 %v1988_v34  ;;  %861 = vmatpush.bf16.msra.mxu3 %v1991_v38 }
 0x198   :  { %823 = vmatpush.bf16.msra.mxu0 %v1994_v44  ;;  %836 = vmatpush.bf16.msra.mxu1 %v1998_v45 }
 0x199   :  { %849 = vmatpush.bf16.msra.mxu2 %v2000_v46  ;;  %862 = vmatpush.bf16.msra.mxu3 %v2003_v50 }
 0x19c   :  { %824 = vmatpush.bf16.msra.mxu0 %v2006_v56  ;;  %837 = vmatpush.bf16.msra.mxu1 %v2010_v57 }
 0x19d   :  { %850 = vmatpush.bf16.msra.mxu2 %v2012_v58  ;;  %863 = vmatpush.bf16.msra.mxu3 %v2015_v62 }
 0x1a0   :  { %825 = vmatpush.bf16.msra.mxu0 %v2018_v5  ;;  %838 = vmatpush.bf16.msra.mxu1 %v2022_v9 }
 0x1a1   :  { %851 = vmatpush.bf16.msra.mxu2 %v2024_v10  ;;  %864 = vmatpush.bf16.msra.mxu3 %v2027_v15 }
 0x1a4   :  { %826 = vmatpush.bf16.msra.mxu0 %v2033_v26  ;;  %839 = vmatpush.bf16.msra.mxu1 %v2037_v27 }
 0x1a5   :  { %852 = vmatpush.bf16.msra.mxu2 %v2039_v28  ;;  %865 = vmatpush.bf16.msra.mxu3 %v2042_v35 }
 0x1a8   :  { %827 = vmatpush.bf16.msra.mxu0 %v2045_v42  ;;  %840 = vmatpush.bf16.msra.mxu1 %v2049_v43 }
 0x1a9   :  { %853 = vmatpush.bf16.msra.mxu2 %v2051_v47  ;;  %866 = vmatpush.bf16.msra.mxu3 %v2054_v48 }
 0x207   :  { %v551_v53 = vpop.f32.mrf.mxu0  ;;  %v564_v51 = vpop.f32.mrf.mxu1 }
 0x208   :  { %v598_v52 = vrot.slane %v551_v53, 6  ;;  %v599_v55 = vrot.slane %v564_v51, 6 }
 0x20a   :  { %v606_v59 = vadd.f32 %v598_v52, %v2130_v63  ;;  %v607_v60 = vadd.f32 %v599_v55, %v2132_v1 }
 0x20c   :  { %v1607_v4 = vmul.f32 -1.442695, %v606_v59  ;;  %v1608_v6 = vmul.f32 -1.442695, %v607_v60 }
 0x20e   :  { %1738 = vpow2.f32 %v1607_v4  ;;  %v577_v41 = vpop.f32.mrf.mxu2  ;;  %v590_v2 = vpop.f32.mrf.mxu3 }
 0x20f   :  { %1740 = vpow2.f32 %v1608_v6  ;;  %v600_v14 = vrot.slane %v577_v41, 6  ;;  %v553_v18 = vpop.f32.mrf.mxu0  ;;  %v566_v54 = vpop.f32.mrf.mxu1  ;;  %v601_v24 = vrot.slane %v590_v2, 6 }
 0x211   :  { %v608_v0 = vadd.f32 %v600_v14, %v2136_v20  ;;  %v609_v37 = vadd.f32 %v601_v24, %v2139_v61 }
 0x213   :  { %v1609_v22 = vmul.f32 -1.442695, %v608_v0 }
 0x214   :  { %v1739_v23 = vpop.eup %1738 }
 0x215   :  { %v1741_v11 = vpop.eup %1740  ;;  %v619_v30 = vadd.f32 1.0, %v1739_v23  ;;  %1742 = vpow2.f32 %v1609_v22  ;;  %v669_v23 = vrot.slane %v2182_v40, 7 }
 0x216   :  { %v620_v13 = vadd.f32 1.0, %v1741_v11  ;;  %v579_v31 = vpop.f32.mrf.mxu2  ;;  %v592_v49 = vpop.f32.mrf.mxu3 }
 0x217   :  { %1744 = vrcp.f32 %v619_v30  ;;  %v633_v59 = vand.u32 2147483648, %v619_v30  ;;  %v631_v6 = vand.u32 2147483647, %v619_v30  ;;  %vm627_vm10 = vweird.f32 %v619_v30 }
 0x218   :  { %1746 = vrcp.f32 %v620_v13  ;;  %v648_v60 = vand.u32 2147483648, %v620_v13  ;;  %v646_v2 = vand.u32 2147483647, %v620_v13  ;;  %vm642_vm11 = vweird.f32 %v620_v13 }
 0x219   :  { %v634_v0 = vor.u32 1.1754944e-38, %v633_v59  ;;  %vm632_vm14 = vcmp.eq.f32.partialorder %v631_v6, 8.507059e+37 }
 0x21a   :  { %v649_v11 = vor.u32 1.1754944e-38, %v648_v60  ;;  %vm647_vm15 = vcmp.eq.f32.partialorder %v646_v2, 8.507059e+37 }
 0x21b   :  { %v1743_v32 = vpop.eup %1742 }
 0x21c   :  { %v621_v19 = vadd.f32 1.0, %v1743_v32 }
 0x21d   :  { %v1745_v36 = vpop.eup %1744 }
 0x21e   :  { %v1747_v39 = vpop.eup %1746  ;;  %v623_v53 = vmul.f32 %v1745_v36, %v619_v30  ;;  %1748 = vrcp.f32 %v621_v19  ;;  %vm628_vm8 = vweird.f32 %v1745_v36  ;;  %v663_v40 = vand.u32 2147483648, %v621_v19 }
 0x21f   :  { %v638_v51 = vmul.f32 %v1747_v39, %v620_v13  ;;  %1750 = vtanh.f32 %v609_v37  ;;  %vm643_vm9 = vweird.f32 %v1747_v39  ;;  %vm629_vm12 = vmor %vm627_vm10, %vm628_vm8  ;;  %vm657_vm1 = vweird.f32 %v621_v19 }
 0x220   :  { %v624_v52 = vsub.f32 1.0, %v623_v53  ;;  %vm644_vm13 = vmor %vm642_vm11, %vm643_vm9  ;;  %v661_v59 = vand.u32 2147483647, %v621_v19  ;;  %v664_v60 = vor.u32 1.1754944e-38, %v663_v40 }
 0x221   :  { %v639_v55 = vsub.f32 1.0, %v638_v51 }
 0x222   :  { %v625_v4 = vmul.f32 %v1745_v36, %v624_v52  ;;  %vm662_vm3 = vcmp.eq.f32.partialorder %v661_v59, 8.507059e+37 }
 0x223   :  { %v640_v41 = vmul.f32 %v1747_v39, %v639_v55 }
 0x224   :  { %v1749_v14 = vpop.eup %1748  ;;  %v626_v18 = vadd.f32 %v1745_v36, %v625_v4 }
 0x225   :  { %v653_v54 = vmul.f32 %v1749_v14, %v621_v19  ;;  %v641_v22 = vadd.f32 %v1747_v39, %v640_v41  ;;  %v1751_v49 = vpop.eup %1750  ;;  %vm658_vm0 = vweird.f32 %v1749_v14 }
 0x226   :  { %v630_v31 = vsel %vm629_vm12, %v1745_v36, %v626_v18  ;;  %vm659_vm2 = vmor %vm657_vm1, %vm658_vm0 }
 0x227   :  { %v654_v24 = vsub.f32 1.0, %v653_v54  ;;  %v635_v32 = vsel %vm632_vm14, %v634_v0, %v630_v31  ;;  %v645_v37 = vsel %vm644_vm13, %v1747_v39, %v641_v22 }
 0x228   :  { %v650_v53 = vsel %vm647_vm15, %v649_v11, %v645_v37  ;;  %v672_v51 = vmul.f32 %v1751_v49, %v635_v32 }
 0x229   :  { %v671_v52 = vmul.f32 %v669_v23, %v650_v53  ;;  %v655_v30 = vmul.f32 %v1749_v14, %v654_v24 }
 0x22b   :  { %v2222_v13 = vadd.f32 %v672_v51, %v671_v52  ;;  %v656_v55 = vadd.f32 %v1749_v14, %v655_v30 }
 0x22d   :  { %1752 = vtanh.f32 %v2222_v13  ;;  %v660_v36 = vsel %vm659_vm2, %v1749_v14, %v656_v55 }
 0x22e   :  { %v665_v39 = vsel %vm662_vm3, %v664_v60, %v660_v36 }
 0x233   :  { %v1753_v4 = vpop.eup %1752 }
 0x234   :  { %v675_v6 = vmul.f32 %v1753_v4, %v665_v39 }
 0x236   :  { %v676_v41 = vpack.c.bf16 %v675_v6, %v675_v6 }
 0x238   :  { %v678_v2 = vrot.slane %v676_v41, 1 }
 0x23a   :  { %688 = vmatmul.bf16.vlgmr.msrb.gmra.mxu0 %v678_v2  ;;  %701 = vmatmul.bf16.vlgmr.msrb.gmra.mxu1 %v678_v2 }
 0x23b   :  { %714 = vmatmul.bf16.vlgmr.msrb.gmra.mxu2 %v678_v2  ;;  %727 = vmatmul.bf16.vlgmr.msrb.gmra.mxu3 %v678_v2 }
 0x23c   :  { %958 = vmatpush.bf16.msrb.mxu0 %v1961_v3  ;;  %971 = vmatpush.bf16.msrb.mxu1 %v1963_v7 }
 0x23d   :  { %984 = vmatpush.bf16.msrb.mxu2 %v1965_v8  ;;  %997 = vmatpush.bf16.msrb.mxu3 %v1968_v12 }
 0x240   :  { %959 = vmatpush.bf16.msrb.mxu0 %v1972_v16  ;;  %972 = vmatpush.bf16.msrb.mxu1 %v1974_v17 }
 0x241   :  { %985 = vmatpush.bf16.msrb.mxu2 %v1977_v21  ;;  %998 = vmatpush.bf16.msrb.mxu3 %v1979_v25 }
 0x244   :  { %960 = vmatpush.bf16.msrb.mxu0 %v1982_v29  ;;  %973 = vmatpush.bf16.msrb.mxu1 %v1986_v33 }
 0x245   :  { %986 = vmatpush.bf16.msrb.mxu2 %v1988_v34  ;;  %999 = vmatpush.bf16.msrb.mxu3 %v1991_v38 }
 0x248   :  { %961 = vmatpush.bf16.msrb.mxu0 %v1994_v44  ;;  %974 = vmatpush.bf16.msrb.mxu1 %v1998_v45 }
 0x249   :  { %987 = vmatpush.bf16.msrb.mxu2 %v2000_v46  ;;  %1000 = vmatpush.bf16.msrb.mxu3 %v2003_v50 }
 0x24c   :  { %962 = vmatpush.bf16.msrb.mxu0 %v2006_v56  ;;  %975 = vmatpush.bf16.msrb.mxu1 %v2010_v57 }
 0x24d   :  { %988 = vmatpush.bf16.msrb.mxu2 %v2012_v58  ;;  %1001 = vmatpush.bf16.msrb.mxu3 %v2015_v62 }
 0x250   :  { %963 = vmatpush.bf16.msrb.mxu0 %v2018_v5  ;;  %976 = vmatpush.bf16.msrb.mxu1 %v2022_v9 }
 0x251   :  { %989 = vmatpush.bf16.msrb.mxu2 %v2024_v10  ;;  %1002 = vmatpush.bf16.msrb.mxu3 %v2027_v15 }
 0x254   :  { %964 = vmatpush.bf16.msrb.mxu0 %v2033_v26  ;;  %977 = vmatpush.bf16.msrb.mxu1 %v2037_v27 }
 0x255   :  { %990 = vmatpush.bf16.msrb.mxu2 %v2039_v28  ;;  %1003 = vmatpush.bf16.msrb.mxu3 %v2042_v35 }
 0x258   :  { %965 = vmatpush.bf16.msrb.mxu0 %v2045_v42  ;;  %978 = vmatpush.bf16.msrb.mxu1 %v2049_v43 }
 0x259   :  { %991 = vmatpush.bf16.msrb.mxu2 %v2051_v47  ;;  %1004 = vmatpush.bf16.msrb.mxu3 %v2054_v48 }
 0x2b7   :  { %v689_v19 = vpop.f32.mrf.mxu0  ;;  %v702_v14 = vpop.f32.mrf.mxu1 }
 0x2b8   :  { %v736_v18 = vrot.slane %v689_v19, 5  ;;  %v737_v54 = vrot.slane %v702_v14, 5 }
 0x2ba   :  { %v744_v0 = vadd.f32 %v736_v18, %v2130_v63  ;;  %v745_v22 = vadd.f32 %v737_v54, %v2132_v1 }
 0x2bc   :  { %v1610_v23 = vmul.f32 -1.442695, %v744_v0  ;;  %v1611_v11 = vmul.f32 -1.442695, %v745_v22 }
 0x2be   :  { %1754 = vpow2.f32 %v1610_v23  ;;  %v715_v31 = vpop.f32.mrf.mxu2  ;;  %v728_v49 = vpop.f32.mrf.mxu3 }
 0x2bf   :  { %1756 = vpow2.f32 %v1611_v11  ;;  %v738_v24 = vrot.slane %v715_v31, 5  ;;  %v691_v32 = vpop.f32.mrf.mxu0  ;;  %v704_v37 = vpop.f32.mrf.mxu1  ;;  %v739_v60 = vrot.slane %v728_v49, 5 }
 0x2c1   :  { %v746_v53 = vadd.f32 %v738_v24, %v2136_v20  ;;  %v747_v41 = vadd.f32 %v739_v60, %v2139_v61 }
 0x2c3   :  { %v1612_v51 = vmul.f32 -1.442695, %v746_v53 }
 0x2c4   :  { %v1755_v52 = vpop.eup %1754 }
 0x2c5   :  { %v1757_v30 = vpop.eup %1756  ;;  %v757_v55 = vadd.f32 1.0, %v1755_v52  ;;  %1758 = vpow2.f32 %v1612_v51  ;;  %v807_v52 = vrot.slane %v2222_v13, 7 }
 0x2c6   :  { %v758_v40 = vadd.f32 1.0, %v1757_v30  ;;  %v717_v59 = vpop.f32.mrf.mxu2  ;;  %v730_v36 = vpop.f32.mrf.mxu3 }
 0x2c7   :  { %1760 = vrcp.f32 %v757_v55  ;;  %v771_v0 = vand.u32 2147483648, %v757_v55  ;;  %v769_v11 = vand.u32 2147483647, %v757_v55  ;;  %vm765_vm6 = vweird.f32 %v757_v55 }
 0x2c8   :  { %1762 = vrcp.f32 %v758_v40  ;;  %v786_v22 = vand.u32 2147483648, %v758_v40  ;;  %v784_v49 = vand.u32 2147483647, %v758_v40  ;;  %vm780_vm7 = vweird.f32 %v758_v40 }
 0x2c9   :  { %v772_v53 = vor.u32 1.1754944e-38, %v771_v0  ;;  %vm770_vm10 = vcmp.eq.f32.partialorder %v769_v11, 8.507059e+37 }
 0x2ca   :  { %v787_v30 = vor.u32 1.1754944e-38, %v786_v22  ;;  %vm785_vm11 = vcmp.eq.f32.partialorder %v784_v49, 8.507059e+37 }
 0x2cb   :  { %v1759_v4 = vpop.eup %1758 }
 0x2cc   :  { %v759_v39 = vadd.f32 1.0, %v1759_v4 }
 0x2cd   :  { %v1761_v6 = vpop.eup %1760 }
 0x2ce   :  { %v1763_v2 = vpop.eup %1762  ;;  %v761_v19 = vmul.f32 %v1761_v6, %v757_v55  ;;  %1764 = vrcp.f32 %v759_v39  ;;  %vm766_vm4 = vweird.f32 %v1761_v6  ;;  %v801_v13 = vand.u32 2147483648, %v759_v39 }
 0x2cf   :  { %v776_v14 = vmul.f32 %v1763_v2, %v758_v40  ;;  %1766 = vtanh.f32 %v747_v41  ;;  %vm781_vm5 = vweird.f32 %v1763_v2  ;;  %vm767_vm8 = vmor %vm765_vm6, %vm766_vm4  ;;  %vm795_vm13 = vweird.f32 %v759_v39 }
 0x2d0   :  { %v762_v18 = vsub.f32 1.0, %v761_v19  ;;  %vm782_vm9 = vmor %vm780_vm7, %vm781_vm5  ;;  %v799_v0 = vand.u32 2147483647, %v759_v39  ;;  %v802_v22 = vor.u32 1.1754944e-38, %v801_v13 }
 0x2d1   :  { %v777_v54 = vsub.f32 1.0, %v776_v14 }
 0x2d2   :  { %v763_v23 = vmul.f32 %v1761_v6, %v762_v18  ;;  %vm800_vm15 = vcmp.eq.f32.partialorder %v799_v0, 8.507059e+37 }
 0x2d3   :  { %v778_v31 = vmul.f32 %v1763_v2, %v777_v54 }
 0x2d4   :  { %v1765_v24 = vpop.eup %1764  ;;  %v764_v32 = vadd.f32 %v1761_v6, %v763_v23 }
 0x2d5   :  { %v791_v37 = vmul.f32 %v1765_v24, %v759_v39  ;;  %v779_v51 = vadd.f32 %v1763_v2, %v778_v31  ;;  %v1767_v36 = vpop.eup %1766  ;;  %vm796_vm12 = vweird.f32 %v1765_v24 }
 0x2d6   :  { %v768_v59 = vsel %vm767_vm8, %v1761_v6, %v764_v32  ;;  %vm797_vm14 = vmor %vm795_vm13, %vm796_vm12 }
 0x2d7   :  { %v792_v60 = vsub.f32 1.0, %v791_v37  ;;  %v773_v4 = vsel %vm770_vm10, %v772_v53, %v768_v59  ;;  %v783_v41 = vsel %vm782_vm9, %v1763_v2, %v779_v51 }
 0x2d8   :  { %v788_v19 = vsel %vm785_vm11, %v787_v30, %v783_v41  ;;  %v810_v14 = vmul.f32 %v1767_v36, %v773_v4 }
 0x2d9   :  { %v809_v18 = vmul.f32 %v807_v52, %v788_v19  ;;  %v793_v55 = vmul.f32 %v1765_v24, %v792_v60 }
 0x2db   :  { %v2262_v40 = vadd.f32 %v810_v14, %v809_v18  ;;  %v794_v54 = vadd.f32 %v1765_v24, %v793_v55 }
 0x2dd   :  { %1768 = vtanh.f32 %v2262_v40  ;;  %v798_v6 = vsel %vm797_vm14, %v1765_v24, %v794_v54 }
 0x2de   :  { %v803_v2 = vsel %vm800_vm15, %v802_v22, %v798_v6 }
 0x2e3   :  { %v1769_v23 = vpop.eup %1768 }
 0x2e4   :  { %v813_v11 = vmul.f32 %v1769_v23, %v803_v2 }
 0x2e6   :  { %v814_v31 = vpack.c.bf16 %v813_v11, %v813_v11 }
 0x2e8   :  { %v816_v49 = vshrl.u32 %v814_v31, 16 }
 0x2ea   :  { %v818_v32 = vrot.slane %v816_v49, 1 }
 0x2ec   :  { %828 = vmatmul.bf16.vlgmr.msra.gmra.mxu0 %v818_v32  ;;  %841 = vmatmul.bf16.vlgmr.msra.gmra.mxu1 %v818_v32 }
 0x2ed   :  { %854 = vmatmul.bf16.vlgmr.msra.gmra.mxu2 %v818_v32  ;;  %867 = vmatmul.bf16.vlgmr.msra.gmra.mxu3 %v818_v32 }
 0x2ee   :  { %1098 = vmatpush.bf16.msra.mxu0 %v1961_v3  ;;  %1111 = vmatpush.bf16.msra.mxu1 %v1963_v7 }
 0x2ef   :  { %1124 = vmatpush.bf16.msra.mxu2 %v1965_v8  ;;  %1137 = vmatpush.bf16.msra.mxu3 %v1968_v12 }
 0x2f2   :  { %1099 = vmatpush.bf16.msra.mxu0 %v1972_v16  ;;  %1112 = vmatpush.bf16.msra.mxu1 %v1974_v17 }
 0x2f3   :  { %1125 = vmatpush.bf16.msra.mxu2 %v1977_v21  ;;  %1138 = vmatpush.bf16.msra.mxu3 %v1979_v25 }
 0x2f6   :  { %1100 = vmatpush.bf16.msra.mxu0 %v1982_v29  ;;  %1113 = vmatpush.bf16.msra.mxu1 %v1986_v33 }
 0x2f7   :  { %1126 = vmatpush.bf16.msra.mxu2 %v1988_v34  ;;  %1139 = vmatpush.bf16.msra.mxu3 %v1991_v38 }
 0x2fa   :  { %1101 = vmatpush.bf16.msra.mxu0 %v1994_v44  ;;  %1114 = vmatpush.bf16.msra.mxu1 %v1998_v45 }
 0x2fb   :  { %1127 = vmatpush.bf16.msra.mxu2 %v2000_v46  ;;  %1140 = vmatpush.bf16.msra.mxu3 %v2003_v50 }
 0x2fe   :  { %1102 = vmatpush.bf16.msra.mxu0 %v2006_v56  ;;  %1115 = vmatpush.bf16.msra.mxu1 %v2010_v57 }
 0x2ff   :  { %1128 = vmatpush.bf16.msra.mxu2 %v2012_v58  ;;  %1141 = vmatpush.bf16.msra.mxu3 %v2015_v62 }
 0x302   :  { %1103 = vmatpush.bf16.msra.mxu0 %v2018_v5  ;;  %1116 = vmatpush.bf16.msra.mxu1 %v2022_v9 }
 0x303   :  { %1129 = vmatpush.bf16.msra.mxu2 %v2024_v10  ;;  %1142 = vmatpush.bf16.msra.mxu3 %v2027_v15 }
 0x306   :  { %1104 = vmatpush.bf16.msra.mxu0 %v2033_v26  ;;  %1117 = vmatpush.bf16.msra.mxu1 %v2037_v27 }
 0x307   :  { %1130 = vmatpush.bf16.msra.mxu2 %v2039_v28  ;;  %1143 = vmatpush.bf16.msra.mxu3 %v2042_v35 }
 0x30a   :  { %1105 = vmatpush.bf16.msra.mxu0 %v2045_v42  ;;  %1118 = vmatpush.bf16.msra.mxu1 %v2049_v43 }
 0x30b   :  { %1131 = vmatpush.bf16.msra.mxu2 %v2051_v47  ;;  %1144 = vmatpush.bf16.msra.mxu3 %v2054_v48 }
 0x369   :  { %v829_v39 = vpop.f32.mrf.mxu0  ;;  %v842_v24 = vpop.f32.mrf.mxu1 }
 0x36a   :  { %v876_v37 = vrot.slane %v829_v39, 4  ;;  %v877_v53 = vrot.slane %v842_v24, 4 }
 0x36c   :  { %v884_v51 = vadd.f32 %v876_v37, %v2130_v63  ;;  %v885_v52 = vadd.f32 %v877_v53, %v2132_v1 }
 0x36e   :  { %v1613_v30 = vmul.f32 -1.442695, %v884_v51  ;;  %v1614_v59 = vmul.f32 -1.442695, %v885_v52 }
 0x370   :  { %1770 = vpow2.f32 %v1613_v30  ;;  %v855_v36 = vpop.f32.mrf.mxu2  ;;  %v868_v60 = vpop.f32.mrf.mxu3 }
 0x371   :  { %1772 = vpow2.f32 %v1614_v59  ;;  %v878_v4 = vrot.slane %v855_v36, 4  ;;  %v831_v41 = vpop.f32.mrf.mxu0  ;;  %v844_v19 = vpop.f32.mrf.mxu1  ;;  %v879_v23 = vrot.slane %v868_v60, 4 }
 0x373   :  { %v886_v14 = vadd.f32 %v878_v4, %v2136_v20  ;;  %v887_v49 = vadd.f32 %v879_v23, %v2139_v61 }
 0x375   :  { %v1615_v18 = vmul.f32 -1.442695, %v886_v14 }
 0x376   :  { %v1771_v55 = vpop.eup %1770 }
 0x377   :  { %v1773_v54 = vpop.eup %1772  ;;  %v897_v13 = vadd.f32 1.0, %v1771_v55  ;;  %1774 = vpow2.f32 %v1615_v18  ;;  %v947_v55 = vrot.slane %v2262_v40, 7 }
 0x378   :  { %v898_v0 = vadd.f32 1.0, %v1773_v54  ;;  %v857_v6 = vpop.f32.mrf.mxu2  ;;  %v870_v22 = vpop.f32.mrf.mxu3 }
 0x379   :  { %1776 = vrcp.f32 %v897_v13  ;;  %v911_v51 = vand.u32 2147483648, %v897_v13  ;;  %v909_v59 = vand.u32 2147483647, %v897_v13  ;;  %vm905_vm2 = vweird.f32 %v897_v13 }
 0x37a   :  { %1778 = vrcp.f32 %v898_v0  ;;  %v926_v52 = vand.u32 2147483648, %v898_v0  ;;  %v924_v60 = vand.u32 2147483647, %v898_v0  ;;  %vm920_vm3 = vweird.f32 %v898_v0 }
 0x37b   :  { %v912_v14 = vor.u32 1.1754944e-38, %v911_v51  ;;  %vm910_vm6 = vcmp.eq.f32.partialorder %v909_v59, 8.507059e+37 }
 0x37c   :  { %v927_v54 = vor.u32 1.1754944e-38, %v926_v52  ;;  %vm925_vm7 = vcmp.eq.f32.partialorder %v924_v60, 8.507059e+37 }
 0x37d   :  { %v1775_v2 = vpop.eup %1774 }
 0x37e   :  { %v899_v11 = vadd.f32 1.0, %v1775_v2 }
 0x37f   :  { %v1777_v31 = vpop.eup %1776 }
 0x380   :  { %v1779_v32 = vpop.eup %1778  ;;  %v901_v39 = vmul.f32 %v1777_v31, %v897_v13  ;;  %1780 = vrcp.f32 %v899_v11  ;;  %vm906_vm0 = vweird.f32 %v1777_v31  ;;  %v941_v40 = vand.u32 2147483648, %v899_v11 }
 0x381   :  { %v916_v24 = vmul.f32 %v1779_v32, %v898_v0  ;;  %1782 = vtanh.f32 %v887_v49  ;;  %vm921_vm1 = vweird.f32 %v1779_v32  ;;  %vm907_vm4 = vmor %vm905_vm2, %vm906_vm0  ;;  %vm935_vm9 = vweird.f32 %v899_v11 }
 0x382   :  { %v902_v37 = vsub.f32 1.0, %v901_v39  ;;  %vm922_vm5 = vmor %vm920_vm3, %vm921_vm1  ;;  %v939_v51 = vand.u32 2147483647, %v899_v11  ;;  %v942_v52 = vor.u32 1.1754944e-38, %v941_v40 }
 0x383   :  { %v917_v53 = vsub.f32 1.0, %v916_v24 }
 0x384   :  { %v903_v30 = vmul.f32 %v1777_v31, %v902_v37  ;;  %vm940_vm11 = vcmp.eq.f32.partialorder %v939_v51, 8.507059e+37 }
 0x385   :  { %v918_v36 = vmul.f32 %v1779_v32, %v917_v53 }
 0x386   :  { %v1781_v4 = vpop.eup %1780  ;;  %v904_v41 = vadd.f32 %v1777_v31, %v903_v30 }
 0x387   :  { %v931_v19 = vmul.f32 %v1781_v4, %v899_v11  ;;  %v919_v18 = vadd.f32 %v1779_v32, %v918_v36  ;;  %v1783_v22 = vpop.eup %1782  ;;  %vm936_vm8 = vweird.f32 %v1781_v4 }
 0x388   :  { %v908_v6 = vsel %vm907_vm4, %v1777_v31, %v904_v41  ;;  %vm937_vm10 = vmor %vm935_vm9, %vm936_vm8 }
 0x389   :  { %v932_v23 = vsub.f32 1.0, %v931_v19  ;;  %v913_v2 = vsel %vm910_vm6, %v912_v14, %v908_v6  ;;  %v923_v49 = vsel %vm922_vm5, %v1779_v32, %v919_v18 }
 0x38a   :  { %v928_v39 = vsel %vm925_vm7, %v927_v54, %v923_v49  ;;  %v950_v24 = vmul.f32 %v1783_v22, %v913_v2 }
 0x38b   :  { %v949_v37 = vmul.f32 %v947_v55, %v928_v39  ;;  %v933_v13 = vmul.f32 %v1781_v4, %v932_v23 }
 0x38d   :  { %v2302_v0 = vadd.f32 %v950_v24, %v949_v37  ;;  %v934_v53 = vadd.f32 %v1781_v4, %v933_v13 }
 0x38f   :  { %1784 = vtanh.f32 %v2302_v0  ;;  %v938_v31 = vsel %vm937_vm10, %v1781_v4, %v934_v53  ;;  %v1085_v23 = vrot.slane %v2302_v0, 7 }
 0x390   :  { %v943_v32 = vsel %vm940_vm11, %v942_v52, %v938_v31 }
 0x395   :  { %v1785_v30 = vpop.eup %1784 }
 0x396   :  { %v953_v59 = vmul.f32 %v1785_v30, %v943_v32 }
 0x398   :  { %v954_v36 = vpack.c.bf16 %v953_v59, %v953_v59 }
 0x39a   :  { %v956_v60 = vrot.slane %v954_v36, 2 }
 0x39c   :  { %966 = vmatmul.bf16.vlgmr.msrb.gmra.mxu0 %v956_v60  ;;  %979 = vmatmul.bf16.vlgmr.msrb.gmra.mxu1 %v956_v60 }
 0x39d   :  { %992 = vmatmul.bf16.vlgmr.msrb.gmra.mxu2 %v956_v60  ;;  %1005 = vmatmul.bf16.vlgmr.msrb.gmra.mxu3 %v956_v60 }
 0x39e   :  { %1236 = vmatpush.bf16.msrb.mxu0 %v1961_v3  ;;  %1249 = vmatpush.bf16.msrb.mxu1 %v1963_v7 }
 0x39f   :  { %1262 = vmatpush.bf16.msrb.mxu2 %v1965_v8  ;;  %1275 = vmatpush.bf16.msrb.mxu3 %v1968_v12 }
 0x3a2   :  { %1237 = vmatpush.bf16.msrb.mxu0 %v1972_v16  ;;  %1250 = vmatpush.bf16.msrb.mxu1 %v1974_v17 }
 0x3a3   :  { %1263 = vmatpush.bf16.msrb.mxu2 %v1977_v21  ;;  %1276 = vmatpush.bf16.msrb.mxu3 %v1979_v25 }
 0x3a6   :  { %1238 = vmatpush.bf16.msrb.mxu0 %v1982_v29  ;;  %1251 = vmatpush.bf16.msrb.mxu1 %v1986_v33 }
 0x3a7   :  { %1264 = vmatpush.bf16.msrb.mxu2 %v1988_v34  ;;  %1277 = vmatpush.bf16.msrb.mxu3 %v1991_v38 }
 0x3aa   :  { %1239 = vmatpush.bf16.msrb.mxu0 %v1994_v44  ;;  %1252 = vmatpush.bf16.msrb.mxu1 %v1998_v45 }
 0x3ab   :  { %1265 = vmatpush.bf16.msrb.mxu2 %v2000_v46  ;;  %1278 = vmatpush.bf16.msrb.mxu3 %v2003_v50 }
 0x3ae   :  { %1240 = vmatpush.bf16.msrb.mxu0 %v2006_v56  ;;  %1253 = vmatpush.bf16.msrb.mxu1 %v2010_v57 }
 0x3af   :  { %1266 = vmatpush.bf16.msrb.mxu2 %v2012_v58  ;;  %1279 = vmatpush.bf16.msrb.mxu3 %v2015_v62 }
 0x3b2   :  { %1241 = vmatpush.bf16.msrb.mxu0 %v2018_v5  ;;  %1254 = vmatpush.bf16.msrb.mxu1 %v2022_v9 }
 0x3b3   :  { %1267 = vmatpush.bf16.msrb.mxu2 %v2024_v10  ;;  %1280 = vmatpush.bf16.msrb.mxu3 %v2027_v15 }
 0x3b6   :  { %1242 = vmatpush.bf16.msrb.mxu0 %v2033_v26  ;;  %1255 = vmatpush.bf16.msrb.mxu1 %v2037_v27 }
 0x3b7   :  { %1268 = vmatpush.bf16.msrb.mxu2 %v2039_v28  ;;  %1281 = vmatpush.bf16.msrb.mxu3 %v2042_v35 }
 0x3ba   :  { %1243 = vmatpush.bf16.msrb.mxu0 %v2045_v42  ;;  %1256 = vmatpush.bf16.msrb.mxu1 %v2049_v43 }
 0x3bb   :  { %1269 = vmatpush.bf16.msrb.mxu2 %v2051_v47  ;;  %1282 = vmatpush.bf16.msrb.mxu3 %v2054_v48 }
 0x419   :  { %v967_v3 = vpop.f32.mrf.mxu0  ;;  %v980_v7 = vpop.f32.mrf.mxu1 }
 0x41a   :  { %v1014_v8 = vrot.slane %v967_v3, 3  ;;  %v1015_v12 = vrot.slane %v980_v7, 3 }
 0x41c   :  { %v1022_v16 = vadd.f32 %v1014_v8, %v2130_v63  ;;  %v1023_v17 = vadd.f32 %v1015_v12, %v2132_v1 }
 0x41e   :  { %v1616_v21 = vmul.f32 -1.442695, %v1022_v16  ;;  %v1617_v25 = vmul.f32 -1.442695, %v1023_v17 }
 0x420   :  { %1786 = vpow2.f32 %v1616_v21  ;;  %v993_v29 = vpop.f32.mrf.mxu2  ;;  %v1006_v33 = vpop.f32.mrf.mxu3 }
 0x421   :  { %1788 = vpow2.f32 %v1617_v25  ;;  %v1016_v34 = vrot.slane %v993_v29, 3  ;;  %v969_v38 = vpop.f32.mrf.mxu0  ;;  %v982_v44 = vpop.f32.mrf.mxu1  ;;  %v1017_v9 = vrot.slane %v1006_v33, 3 }
 0x423   :  { %v1024_v45 = vadd.f32 %v1016_v34, %v2136_v20  ;;  %v1025_v27 = vadd.f32 %v1017_v9, %v2139_v61 }
 0x425   :  { %v1618_v46 = vmul.f32 -1.442695, %v1024_v45 }
 0x426   :  { %v1787_v50 = vpop.eup %1786 }
 0x427   :  { %v1789_v56 = vpop.eup %1788  ;;  %v1035_v57 = vadd.f32 1.0, %v1787_v50  ;;  %1790 = vpow2.f32 %v1618_v46 }
 0x428   :  { %v1036_v58 = vadd.f32 1.0, %v1789_v56  ;;  %v995_v62 = vpop.f32.mrf.mxu2  ;;  %v1008_v5 = vpop.f32.mrf.mxu3 }
 0x429   :  { %1792 = vrcp.f32 %v1035_v57  ;;  %v1049_v48 = vand.u32 2147483648, %v1035_v57  ;;  %v1047_v41 = vand.u32 2147483647, %v1035_v57  ;;  %vm1043_vm14 = vweird.f32 %v1035_v57 }
 0x42a   :  { %1794 = vrcp.f32 %v1036_v58  ;;  %v1064_v11 = vand.u32 2147483648, %v1036_v58  ;;  %v1062_v14 = vand.u32 2147483647, %v1036_v58  ;;  %vm1058_vm15 = vweird.f32 %v1036_v58 }
 0x42b   :  { %v1050_v6 = vor.u32 1.1754944e-38, %v1049_v48  ;;  %vm1048_vm2 = vcmp.eq.f32.partialorder %v1047_v41, 8.507059e+37 }
 0x42c   :  { %v1065_v2 = vor.u32 1.1754944e-38, %v1064_v11  ;;  %vm1063_vm3 = vcmp.eq.f32.partialorder %v1062_v14, 8.507059e+37 }
 0x42d   :  { %v1791_v10 = vpop.eup %1790 }
 0x42e   :  { %v1037_v15 = vadd.f32 1.0, %v1791_v10 }
 0x42f   :  { %v1793_v26 = vpop.eup %1792 }
 0x430   :  { %v1795_v28 = vpop.eup %1794  ;;  %v1039_v35 = vmul.f32 %v1793_v26, %v1035_v57  ;;  %1796 = vrcp.f32 %v1037_v15  ;;  %vm1044_vm12 = vweird.f32 %v1793_v26  ;;  %v1079_v0 = vand.u32 2147483648, %v1037_v15 }
 0x431   :  { %v1054_v42 = vmul.f32 %v1795_v28, %v1036_v58  ;;  %1798 = vtanh.f32 %v1025_v27  ;;  %vm1059_vm13 = vweird.f32 %v1795_v28  ;;  %vm1045_vm0 = vmor %vm1043_vm14, %vm1044_vm12  ;;  %vm1073_vm5 = vweird.f32 %v1037_v15 }
 0x432   :  { %v1040_v43 = vsub.f32 1.0, %v1039_v35  ;;  %vm1060_vm1 = vmor %vm1058_vm15, %vm1059_vm13  ;;  %v1077_v32 = vand.u32 2147483647, %v1037_v15  ;;  %v1080_v36 = vor.u32 1.1754944e-38, %v1079_v0 }
 0x433   :  { %v1055_v47 = vsub.f32 1.0, %v1054_v42 }
 0x434   :  { %v1041_v4 = vmul.f32 %v1793_v26, %v1040_v43  ;;  %vm1078_vm7 = vcmp.eq.f32.partialorder %v1077_v32, 8.507059e+37 }
 0x435   :  { %v1056_v19 = vmul.f32 %v1795_v28, %v1055_v47 }
 0x436   :  { %v1797_v18 = vpop.eup %1796  ;;  %v1042_v55 = vadd.f32 %v1793_v26, %v1041_v4 }
 0x437   :  { %v1069_v54 = vmul.f32 %v1797_v18, %v1037_v15  ;;  %v1057_v22 = vadd.f32 %v1795_v28, %v1056_v19  ;;  %v1799_v39 = vpop.eup %1798  ;;  %vm1074_vm4 = vweird.f32 %v1797_v18 }
 0x438   :  { %v1046_v49 = vsel %vm1045_vm0, %v1793_v26, %v1042_v55  ;;  %vm1075_vm6 = vmor %vm1073_vm5, %vm1074_vm4 }
 0x439   :  { %v1070_v24 = vsub.f32 1.0, %v1069_v54  ;;  %v1051_v37 = vsel %vm1048_vm2, %v1050_v6, %v1046_v49  ;;  %v1061_v13 = vsel %vm1060_vm1, %v1795_v28, %v1057_v22 }
 0x43a   :  { %v1066_v53 = vsel %vm1063_vm3, %v1065_v2, %v1061_v13  ;;  %v1088_v40 = vmul.f32 %v1799_v39, %v1051_v37 }
 0x43b   :  { %v1087_v51 = vmul.f32 %v1085_v23, %v1066_v53  ;;  %v1071_v31 = vmul.f32 %v1797_v18, %v1070_v24 }
 0x43d   :  { %v2342_v52 = vadd.f32 %v1088_v40, %v1087_v51  ;;  %v1072_v30 = vadd.f32 %v1797_v18, %v1071_v31 }
 0x43f   :  { %1800 = vtanh.f32 %v2342_v52  ;;  %v1076_v59 = vsel %vm1075_vm6, %v1797_v18, %v1072_v30  ;;  %v1225_v37 = vrot.slane %v2342_v52, 7 }
 0x440   :  { %v1081_v3 = vsel %vm1078_vm7, %v1080_v36, %v1076_v59 }
 0x445   :  { %v1801_v60 = vpop.eup %1800 }
 0x446   :  { %v1091_v7 = vmul.f32 %v1801_v60, %v1081_v3 }
 0x448   :  { %v1092_v8 = vpack.c.bf16 %v1091_v7, %v1091_v7 }
 0x44a   :  { %v1094_v12 = vshrl.u32 %v1092_v8, 16 }
 0x44c   :  { %v1096_v16 = vrot.slane %v1094_v12, 2 }
 0x44e   :  { %1106 = vmatmul.bf16.vlgmr.msra.gmra.mxu0 %v1096_v16  ;;  %1119 = vmatmul.bf16.vlgmr.msra.gmra.mxu1 %v1096_v16 }
 0x44f   :  { %1132 = vmatmul.bf16.vlgmr.msra.gmra.mxu2 %v1096_v16  ;;  %1145 = vmatmul.bf16.vlgmr.msra.gmra.mxu3 %v1096_v16 }
 0x4cb   :  { %v1107_v17 = vpop.f32.mrf.mxu0  ;;  %v1120_v21 = vpop.f32.mrf.mxu1 }
 0x4cc   :  { %v1154_v25 = vrot.slane %v1107_v17, 2  ;;  %v1155_v29 = vrot.slane %v1120_v21, 2 }
 0x4ce   :  { %v1162_v33 = vadd.f32 %v1154_v25, %v2130_v63  ;;  %v1163_v34 = vadd.f32 %v1155_v29, %v2132_v1 }
 0x4d0   :  { %v1619_v38 = vmul.f32 -1.442695, %v1162_v33  ;;  %v1620_v44 = vmul.f32 -1.442695, %v1163_v34  ;;  %v1696_v33 = vld [vmem:[#allocation5 + $0x38] sm:$0xff]  ;;  %v1695_v34 = vld [vmem:[#allocation5 + $0x30] sm:$0xff] }
 0x4d1   :  { %1441 = vmatpush.bf16.msra.mxu0 %v1696_v33 }
 0x4d2   :  { %1802 = vpow2.f32 %v1619_v38  ;;  %v1133_v45 = vpop.f32.mrf.mxu2  ;;  %v1146_v46 = vpop.f32.mrf.mxu3  ;;  %v1694_v38 = vld [vmem:[#allocation5 + $0x28] sm:$0xff] }
 0x4d3   :  { %1804 = vpow2.f32 %v1620_v44  ;;  %v1156_v50 = vrot.slane %v1133_v45, 2  ;;  %v1109_v56 = vpop.f32.mrf.mxu0  ;;  %v1122_v57 = vpop.f32.mrf.mxu1  ;;  %v1157_v28 = vrot.slane %v1146_v46, 2  ;;  %v1693_v46 = vld [vmem:[#allocation5 + $0x20] sm:$0xff] }
 0x4d5   :  { %v1164_v58 = vadd.f32 %v1156_v50, %v2136_v20  ;;  %v1165_v47 = vadd.f32 %v1157_v28, %v2139_v61  ;;  %1442 = vmatpush.bf16.msra.mxu0 %v1695_v34 }
 0x4d7   :  { %v1621_v62 = vmul.f32 -1.442695, %v1164_v58 }
 0x4d8   :  { %v1803_v5 = vpop.eup %1802 }
 0x4d9   :  { %v1805_v9 = vpop.eup %1804  ;;  %v1175_v10 = vadd.f32 1.0, %v1803_v5  ;;  %1806 = vpow2.f32 %v1621_v62  ;;  %1443 = vmatpush.bf16.msra.mxu0 %v1694_v38  ;;  %v1692_v62 = vld [vmem:[#allocation5 + $0x18] sm:$0xff] }
 0x4da   :  { %v1176_v15 = vadd.f32 1.0, %v1805_v9  ;;  %v1135_v26 = vpop.f32.mrf.mxu2  ;;  %v1148_v27 = vpop.f32.mrf.mxu3 }
 0x4db   :  { %1808 = vrcp.f32 %v1175_v10  ;;  %v1189_v14 = vand.u32 2147483648, %v1175_v10  ;;  %v1187_v54 = vand.u32 2147483647, %v1175_v10  ;;  %vm1183_vm10 = vweird.f32 %v1175_v10 }
 0x4dc   :  { %1810 = vrcp.f32 %v1176_v15  ;;  %v1204_v18 = vand.u32 2147483648, %v1176_v15  ;;  %v1202_v22 = vand.u32 2147483647, %v1176_v15  ;;  %vm1198_vm11 = vweird.f32 %v1176_v15 }
 0x4dd   :  { %v1190_v39 = vor.u32 1.1754944e-38, %v1189_v14  ;;  %vm1188_vm14 = vcmp.eq.f32.partialorder %v1187_v54, 8.507059e+37  ;;  %1444 = vmatpush.bf16.msra.mxu0 %v1693_v46 }
 0x4de   :  { %v1205_v13 = vor.u32 1.1754944e-38, %v1204_v18  ;;  %vm1203_vm15 = vcmp.eq.f32.partialorder %v1202_v22, 8.507059e+37 }
 0x4df   :  { %v1807_v35 = vpop.eup %1806 }
 0x4e0   :  { %v1177_v42 = vadd.f32 1.0, %v1807_v35 }
 0x4e1   :  { %v1809_v43 = vpop.eup %1808  ;;  %1445 = vmatpush.bf16.msra.mxu0 %v1692_v62 }
 0x4e2   :  { %v1811_v48 = vpop.eup %1810  ;;  %v1179_v11 = vmul.f32 %v1809_v43, %v1175_v10  ;;  %1812 = vrcp.f32 %v1177_v42  ;;  %vm1184_vm8 = vweird.f32 %v1809_v43  ;;  %v1219_v52 = vand.u32 2147483648, %v1177_v42  ;;  %v1691_v10 = vld [vmem:[#allocation5 + $0x10] sm:$0xff] }
 0x4e3   :  { %v1194_v4 = vmul.f32 %v1811_v48, %v1176_v15  ;;  %1814 = vtanh.f32 %v1165_v47  ;;  %vm1199_vm9 = vweird.f32 %v1811_v48  ;;  %vm1185_vm12 = vmor %vm1183_vm10, %vm1184_vm8  ;;  %vm1213_vm1 = vweird.f32 %v1177_v42 }
 0x4e4   :  { %v1180_v41 = vsub.f32 1.0, %v1179_v11  ;;  %vm1200_vm13 = vmor %vm1198_vm11, %vm1199_vm9  ;;  %v1217_v7 = vand.u32 2147483647, %v1177_v42  ;;  %v1220_v12 = vor.u32 1.1754944e-38, %v1219_v52  ;;  %v1689_v11 = vld [vmem:[#allocation5] sm:$0xff] }
 0x4e5   :  { %v1195_v19 = vsub.f32 1.0, %v1194_v4  ;;  %1446 = vmatpush.bf16.msra.mxu0 %v1691_v10 }
 0x4e6   :  { %v1181_v55 = vmul.f32 %v1809_v43, %v1180_v41  ;;  %vm1218_vm3 = vcmp.eq.f32.partialorder %v1217_v7, 8.507059e+37 }
 0x4e7   :  { %v1196_v6 = vmul.f32 %v1811_v48, %v1195_v19 }
 0x4e8   :  { %v1813_v23 = vpop.eup %1812  ;;  %v1182_v2 = vadd.f32 %v1809_v43, %v1181_v55 }
 0x4e9   :  { %v1209_v49 = vmul.f32 %v1813_v23, %v1177_v42  ;;  %v1197_v24 = vadd.f32 %v1811_v48, %v1196_v6  ;;  %v1815_v40 = vpop.eup %1814  ;;  %vm1214_vm0 = vweird.f32 %v1813_v23 }
 0x4ea   :  { %v1186_v53 = vsel %vm1185_vm12, %v1809_v43, %v1182_v2  ;;  %vm1215_vm2 = vmor %vm1213_vm1, %vm1214_vm0  ;;  %v1690_v43 = vld [vmem:[#allocation5 + $0x8] sm:$0xff] }
 0x4eb   :  { %v1210_v51 = vsub.f32 1.0, %v1209_v49  ;;  %v1191_v31 = vsel %vm1188_vm14, %v1190_v39, %v1186_v53  ;;  %v1201_v30 = vsel %vm1200_vm13, %v1811_v48, %v1197_v24  ;;  %1447 = vmatpush.bf16.msra.mxu0 %v1690_v43 }
 0x4ec   :  { %v1206_v0 = vsel %vm1203_vm15, %v1205_v13, %v1201_v30  ;;  %v1228_v32 = vmul.f32 %v1815_v40, %v1191_v31 }
 0x4ed   :  { %v1227_v59 = vmul.f32 %v1225_v37, %v1206_v0  ;;  %v1211_v36 = vmul.f32 %v1813_v23, %v1210_v51 }
 0x4ef   :  { %v2350_v60 = vadd.f32 %v1228_v32, %v1227_v59  ;;  %v1212_v3 = vadd.f32 %v1813_v23, %v1211_v36  ;;  %1448 = vmatpush.bf16.msra.mxu0 %v1689_v11 }
 0x4f1   :  { %1816 = vtanh.f32 %v2350_v60  ;;  %v1216_v8 = vsel %vm1215_vm2, %v1813_v23, %v1212_v3  ;;  %v1363_v32 = vrot.slane %v2350_v60, 7 }
 0x4f2   :  { %v1221_v17 = vsel %vm1218_vm3, %v1220_v12, %v1216_v8 }
 0x4f7   :  { %v1817_v16 = vpop.eup %1816 }
 0x4f8   :  { %v1231_v21 = vmul.f32 %v1817_v16, %v1221_v17 }
 0x4fa   :  { %v1232_v25 = vpack.c.bf16 %v1231_v21, %v1231_v21 }
 0x4fc   :  { %v1234_v29 = vrot.slane %v1232_v25, 3 }
 0x4fe   :  { %1244 = vmatmul.bf16.vlgmr.msrb.gmra.mxu0 %v1234_v29  ;;  %1257 = vmatmul.bf16.vlgmr.msrb.gmra.mxu1 %v1234_v29 }
 0x4ff   :  { %1270 = vmatmul.bf16.vlgmr.msrb.gmra.mxu2 %v1234_v29  ;;  %1283 = vmatmul.bf16.vlgmr.msrb.gmra.mxu3 %v1234_v29 }
 0x57b   :  { %v1245_v44 = vpop.f32.mrf.mxu0  ;;  %v1258_v45 = vpop.f32.mrf.mxu1 }
 0x57c   :  { %v1292_v50 = vrot.slane %v1245_v44, 1  ;;  %v1293_v56 = vrot.slane %v1258_v45, 1 }
 0x57e   :  { %v1300_v57 = vadd.f32 %v1292_v50, %v2130_v63  ;;  %v1301_v58 = vadd.f32 %v1293_v56, %v2132_v1 }
 0x580   :  { %v1622_v5 = vmul.f32 -1.442695, %v1300_v57  ;;  %v1623_v9 = vmul.f32 -1.442695, %v1301_v58  ;;  %v1387_v58 = vld [vmem:[%s2369_s5] sm:$0x1] }
 0x582   :  { %1818 = vpow2.f32 %v1622_v5  ;;  %v1271_v15 = vpop.f32.mrf.mxu2  ;;  %v1284_v26 = vpop.f32.mrf.mxu3 }
 0x583   :  { %1820 = vpow2.f32 %v1623_v9  ;;  %v1294_v27 = vrot.slane %v1271_v15, 1  ;;  %v1247_v28 = vpop.f32.mrf.mxu0  ;;  %v1260_v35 = vpop.f32.mrf.mxu1  ;;  %v1295_v14 = vrot.slane %v1284_v26, 1 }
 0x585   :  { %v1302_v42 = vadd.f32 %v1294_v27, %v2136_v20  ;;  %v1303_v20 = vadd.f32 %v1295_v14, %v2139_v61 }
 0x587   :  { %v1624_v47 = vmul.f32 -1.442695, %v1302_v42 }
 0x588   :  { %v1819_v63 = vpop.eup %1818 }
 0x589   :  { %v1821_v48 = vpop.eup %1820  ;;  %v1313_v1 = vadd.f32 1.0, %v1819_v63  ;;  %1822 = vpow2.f32 %v1624_v47 }
 0x58a   :  { %v1314_v4 = vadd.f32 1.0, %v1821_v48  ;;  %v1273_v41 = vpop.f32.mrf.mxu2  ;;  %v1286_v19 = vpop.f32.mrf.mxu3 }
 0x58b   :  { %1824 = vrcp.f32 %v1313_v1  ;;  %v1327_v39 = vand.u32 2147483648, %v1313_v1  ;;  %v1325_v13 = vand.u32 2147483647, %v1313_v1  ;;  %vm1321_vm6 = vweird.f32 %v1313_v1 }
 0x58c   :  { %1826 = vrcp.f32 %v1314_v4  ;;  %v1342_v24 = vand.u32 2147483648, %v1314_v4  ;;  %v1340_v40 = vand.u32 2147483647, %v1314_v4  ;;  %vm1336_vm7 = vweird.f32 %v1314_v4 }
 0x58d   :  { %v1328_v30 = vor.u32 1.1754944e-38, %v1327_v39  ;;  %vm1326_vm10 = vcmp.eq.f32.partialorder %v1325_v13, 8.507059e+37 }
 0x58e   :  { %v1343_v59 = vor.u32 1.1754944e-38, %v1342_v24  ;;  %vm1341_vm11 = vcmp.eq.f32.partialorder %v1340_v40, 8.507059e+37 }
 0x58f   :  { %v1823_v18 = vpop.eup %1822 }
 0x590   :  { %v1315_v55 = vadd.f32 1.0, %v1823_v18 }
 0x591   :  { %v1825_v54 = vpop.eup %1824 }
 0x592   :  { %v1827_v6 = vpop.eup %1826  ;;  %v1317_v22 = vmul.f32 %v1825_v54, %v1313_v1  ;;  %1828 = vrcp.f32 %v1315_v55  ;;  %vm1322_vm4 = vweird.f32 %v1825_v54  ;;  %v1357_v33 = vand.u32 2147483648, %v1315_v55 }
 0x593   :  { %v1332_v23 = vmul.f32 %v1827_v6, %v1314_v4  ;;  %1830 = vtanh.f32 %v1303_v20  ;;  %vm1337_vm5 = vweird.f32 %v1827_v6  ;;  %vm1323_vm8 = vmor %vm1321_vm6, %vm1322_vm4  ;;  %vm1351_vm13 = vweird.f32 %v1315_v55 }
 0x594   :  { %v1318_v2 = vsub.f32 1.0, %v1317_v22  ;;  %vm1338_vm9 = vmor %vm1336_vm7, %vm1337_vm5  ;;  %v1355_v60 = vand.u32 2147483647, %v1315_v55  ;;  %v1358_v38 = vor.u32 1.1754944e-38, %v1357_v33 }
 0x595   :  { %v1333_v49 = vsub.f32 1.0, %v1332_v23 }
 0x596   :  { %v1319_v37 = vmul.f32 %v1825_v54, %v1318_v2  ;;  %vm1356_vm15 = vcmp.eq.f32.partialorder %v1355_v60, 8.507059e+37 }
 0x597   :  { %v1334_v53 = vmul.f32 %v1827_v6, %v1333_v49 }
 0x598   :  { %v1829_v51 = vpop.eup %1828  ;;  %v1320_v31 = vadd.f32 %v1825_v54, %v1319_v37 }
 0x599   :  { %v1347_v61 = vmul.f32 %v1829_v51, %v1315_v55  ;;  %v1335_v0 = vadd.f32 %v1827_v6, %v1334_v53  ;;  %v1831_v3 = vpop.eup %1830  ;;  %vm1352_vm12 = vweird.f32 %v1829_v51 }
 0x59a   :  { %v1324_v36 = vsel %vm1323_vm8, %v1825_v54, %v1320_v31  ;;  %vm1353_vm14 = vmor %vm1351_vm13, %vm1352_vm12 }
 0x59b   :  { %v1348_v52 = vsub.f32 1.0, %v1347_v61  ;;  %v1329_v7 = vsel %vm1326_vm10, %v1328_v30, %v1324_v36  ;;  %v1339_v8 = vsel %vm1338_vm9, %v1827_v6, %v1335_v0 }
 0x59c   :  { %v1344_v12 = vsel %vm1341_vm11, %v1343_v59, %v1339_v8  ;;  %v1366_v16 = vmul.f32 %v1831_v3, %v1329_v7 }
 0x59d   :  { %v1365_v17 = vmul.f32 %v1363_v32, %v1344_v12  ;;  %v1349_v21 = vmul.f32 %v1829_v51, %v1348_v52 }
 0x59f   :  { %v1367_v25 = vadd.f32 %v1366_v16, %v1365_v17  ;;  %v1350_v29 = vadd.f32 %v1829_v51, %v1349_v21 }
 0x5a1   :  { %1832 = vtanh.f32 %v1367_v25  ;;  %v1354_v34 = vsel %vm1353_vm14, %v1829_v51, %v1350_v29 }
 0x5a2   :  { %v1359_v45 = vsel %vm1356_vm15, %v1358_v38, %v1354_v34 }
 0x5a7   :  { %v1833_v44 = vpop.eup %1832 }
 0x5a8   :  { %v1369_v46 = vmul.f32 %v1833_v44, %v1359_v45 }
 0x5aa   :  { %v1370_v50 = vpack.c.bf16 %v1369_v46, %v1369_v46 }
 0x5ac   :  { %v1389_v56 = vshrl.u32 %v1370_v50, 16 }
 0x5ae   :  { %v1391_v57 = vrot.slane %v1389_v56, 3 }
 0x5b0   :  { %1449 = vmatmul.bf16.vlgmr.msra.gmra.mxu0 %v1391_v57 }
 0x62d   :  { %v1450_v62 = vpop.f32.mrf.mxu0 }
 0x62e   :  { %v1451_v5 = vadd.f32 %v1450_v62, %v1387_v58 }
 0x630   :  { %1454 = vst [vmem:[#allocation7] sm:$0x1] %v1451_v5 }
 0x631   :  { %1465 = dma.vmem_to_hbm [thread:$0]  %s1461_s15, 16, %s1463_s18, [#allocation4]  }
 0x635   :  { %v1452_v9 = vpop.f32.mrf.mxu0 }
 0x636   :  { %1910 = dma.done.wait [#allocation4], 16  }
 0x637   :  { %1911 = vsyncadd [#allocation4], 4294967280 }
 0x638   :  { %1470 = vsyncpa [#allocation3], 1 }
 0x639   :  { %1471 = vsyncpa [#allocation6], 1 }
 0x63a   :  { %1472 = vsyncpa [#allocation4], 1 }

</bundles_post_ra>
